<compile_context>
chip_gen: v7x
topology: tpu7x:2x2x1
jax: 0.10.0
libtpu: 0.0.40
codegen_flags: <defaults>
</compile_context>

<pallas_src>
import jax
import jax.numpy as jnp
import numpy as np
from jax import lax
from jax.experimental import pallas as pl
from jax.experimental.pallas import tpu as pltpu

# ---- model hyper-params (small, consistent with the module) -----------------
D_MODEL = 32
N_HEADS = 4
HEAD_DIM = D_MODEL // N_HEADS
D_FF = 64
SEQ = 8
BATCH = 2
EPS = 1e-6
MASK_FILL = -1e10

# packed weight/bias slab column offsets --------------------------------------
# weight slab: (D_FF, SLAB_W); rows 0:D_MODEL hold every d_model-input weight,
# rows 0:D_FF at W2_OFF hold the FF down-projection.
QKV_SELF = 0            # [wq|rot(wq)]/sqrt(hd) (64) ++ [wk|wv|rot(wk)] (96)
WO_SELF = 160           # (32)
Q_CROSS = 192           # (64)
KV_CROSS = 256          # (96)
WO_CROSS = 352          # (32)
W1_OFF = 384            # (64)
W2_OFF = 448            # (32)
NORM_OFF = 480          # (32)  (bias slab only: RMSNorm weight)
SLAB_W = 512


# =============================== Pallas kernel ================================

def _decoder_kernel(x_ref, enc_ref, dmask_ref, xmask_ref, rope_ref,
                    w_ref, b_ref, out_ref, attn_ref):
    f32 = jnp.float32
    D, H, hd = D_MODEL, N_HEADS, HEAD_DIM
    S = x_ref.shape[1]

    x = x_ref[0].astype(f32)                 # (S, D)
    enc = enc_ref[0].astype(f32)             # (S, D)
    cos = rope_ref[:, 0:D]                   # (S, D)   [cos|cos] tiled per head
    sin = rope_ref[:, D:2 * D]               # (S, D)
    g = b_ref[:, NORM_OFF:NORM_OFF + D]      # (1, D)   RMSNorm weight

    def rms(t):
        ms = jnp.mean(t * t, axis=-1, keepdims=True)
        return t * lax.rsqrt(ms + EPS) * g

    # RoPE is a pure element-wise op here: rotate-half was pre-baked into the
    # projection weights, so q_ext = [q | rot_half(q)] etc.
    def rope_q(q_ext):
        return q_ext[:, 0:D] * cos + q_ext[:, D:2 * D] * sin

    def rope_k(kv_ext):                       # kv_ext = [k | v | rot_half(k)]
        return kv_ext[:, 0:D] * cos + kv_ext[:, 2 * D:3 * D] * sin

    def heads_attention(q, k, v, mask_bool, wo, bo, slot):
        """Per-head attention (H=4, unrolled); accumulates the output
        projection per head (no concat) and stores probs to attn_ref."""
        acc = jnp.zeros((S, D), f32)
        for h in range(H):
            lo = h * hd
            qh = q[:, lo:lo + hd]
            kh = k[:, lo:lo + hd]
            vh = v[:, lo:lo + hd]
            # q @ k^T without materializing a transpose.
            sc = lax.dot_general(qh, kh, (((1,), (1,)), ((), ())),
                                 preferred_element_type=f32)          # (S, S)
            sc = jnp.where(mask_bool, MASK_FILL, sc)                  # masked_fill
            m = jnp.max(sc, axis=-1, keepdims=True)
            e = jnp.exp(sc - m)
            p = e * pl.reciprocal(jnp.sum(e, axis=-1, keepdims=True),
                                  approx=False)
            attn_ref[0, slot * H + h] = p.astype(attn_ref.dtype)
            ctx = jnp.dot(p, vh, preferred_element_type=f32)          # (S, hd)
            acc = acc + jnp.dot(ctx, wo[lo:lo + hd, :],
                                preferred_element_type=f32)           # (S, D)
        return acc + bo

    # ---- self-attention sublayer: x + MHA(norm(x), norm(x), norm(x), dec_mask)
    xn = rms(x)
    proj = (jnp.dot(xn, w_ref[0:D, QKV_SELF:WO_SELF],
                    preferred_element_type=f32)
            + b_ref[:, QKV_SELF:WO_SELF])                             # (S, 160)
    q = rope_q(proj[:, 0:2 * D])
    kv = proj[:, 2 * D:5 * D]
    k = rope_k(kv)
    v = kv[:, D:2 * D]
    x = x + heads_attention(q, k, v, dmask_ref[0, 0] > 0.5,
                            w_ref[0:D, WO_SELF:WO_SELF + D],
                            b_ref[:, WO_SELF:WO_SELF + D], slot=0)

    # ---- cross-attention sublayer: x + MHA(norm(x), enc, enc, enc_dec_mask)
    xn = rms(x)
    q_ext = (jnp.dot(xn, w_ref[0:D, Q_CROSS:Q_CROSS + 2 * D],
                     preferred_element_type=f32)
             + b_ref[:, Q_CROSS:Q_CROSS + 2 * D])                     # (S, 64)
    kv = (jnp.dot(enc, w_ref[0:D, KV_CROSS:KV_CROSS + 3 * D],
                  preferred_element_type=f32)
          + b_ref[:, KV_CROSS:KV_CROSS + 3 * D])                      # (S, 96)
    q = rope_q(q_ext)
    k = rope_k(kv)
    v = kv[:, D:2 * D]
    x = x + heads_attention(q, k, v, xmask_ref[0, 0] > 0.5,
                            w_ref[0:D, WO_CROSS:WO_CROSS + D],
                            b_ref[:, WO_CROSS:WO_CROSS + D], slot=1)

    # ---- feed-forward sublayer: x + FF(norm(x))  (dropout = identity)
    xn = rms(x)
    h1 = jnp.maximum(jnp.dot(xn, w_ref[0:D, W1_OFF:W1_OFF + D_FF],
                             preferred_element_type=f32)
                     + b_ref[:, W1_OFF:W1_OFF + D_FF], 0.0)           # (S, D_FF)
    x = x + (jnp.dot(h1, w_ref[:, W2_OFF:W2_OFF + D],
                     preferred_element_type=f32)
             + b_ref[:, W2_OFF:W2_OFF + D])

    out_ref[0] = x.astype(out_ref.dtype)


# ======================= one-time parameter packing ===========================

def get_rotary_emb(seq_len, head_dim):
    half = head_dim // 2
    inv_freq = 1.0 / (10000.0 ** (jnp.arange(half, dtype=jnp.float32) / half))
    t = jnp.arange(seq_len, dtype=jnp.float32)
    freqs = jnp.einsum('i,j->ij', t, inv_freq)                        # (S, half)
    return jnp.cos(freqs), jnp.sin(freqs)


def _rot_half_cols(w):
    """Signed column permutation so (x @ w_rot + b_rot) == rotate_half(x @ w + b)."""
    pre = w.shape[:-1]
    w4 = w.reshape(pre + (N_HEADS, 2, HEAD_DIM // 2))
    w1 = w4[..., 0, :]
    w2 = w4[..., 1, :]
    return jnp.stack([-w2, w1], axis=-2).reshape(w.shape)


def prepare_params(params, seq_len):
    """Fold rotate-half + 1/sqrt(head_dim) into the projection weights and pack
    everything into one weight slab, one bias slab and one cos/sin slab.
    Runs ONCE; the per-call forward does no parameter prep."""
    f32 = jnp.float32
    inv_scale = jnp.asarray(1.0 / np.sqrt(HEAD_DIM), f32)

    def mha_slab(p):
        wq_ext = jnp.concatenate([p['wq'], _rot_half_cols(p['wq'])], axis=1) * inv_scale
        bq_ext = jnp.concatenate([p['bq'], _rot_half_cols(p['bq'])], axis=1) * inv_scale
        wkv = jnp.concatenate([p['wk'], p['wv'], _rot_half_cols(p['wk'])], axis=1)
        bkv = jnp.concatenate([p['bk'], p['bv'], _rot_half_cols(p['bk'])], axis=1)
        return (jnp.concatenate([wq_ext, wkv, p['wo']], axis=1),     # (D, 192)
                jnp.concatenate([bq_ext, bkv, p['bo']], axis=1))     # (1, 192)

    ws, bs = mha_slab(params['self'])
    wc, bc = mha_slab(params['cross'])
    ff = params['ff']

    w_slab = jnp.zeros((D_FF, SLAB_W), f32)
    w_slab = w_slab.at[0:D_MODEL, 0:W1_OFF + D_FF].set(
        jnp.concatenate([ws, wc, ff['w1']], axis=1))
    w_slab = w_slab.at[:, W2_OFF:W2_OFF + D_MODEL].set(ff['w2'])

    b_slab = jnp.zeros((1, SLAB_W), f32)
    b_slab = b_slab.at[:, 0:W1_OFF].set(jnp.concatenate([bs, bc], axis=1))
    b_slab = b_slab.at[:, W1_OFF:W1_OFF + D_FF].set(ff['b1'])
    b_slab = b_slab.at[:, W2_OFF:W2_OFF + D_MODEL].set(ff['b2'])
    b_slab = b_slab.at[:, NORM_OFF:NORM_OFF + D_MODEL].set(params['norm_w'])

    cos, sin = get_rotary_emb(seq_len, HEAD_DIM)                      # (S, hd//2)
    cos_full = jnp.tile(jnp.concatenate([cos, cos], axis=-1), (1, N_HEADS))
    sin_full = jnp.tile(jnp.concatenate([sin, sin], axis=-1), (1, N_HEADS))
    rope = jnp.concatenate([cos_full, sin_full], axis=1)              # (S, 2D)

    return dict(w=w_slab, b=b_slab, rope=rope)


# ================================ forward =====================================

@jax.jit
def decoder_layer_forward(packed, x, enc_out, dec_mask, enc_dec_mask):
    B, S, D = x.shape
    assert D == D_MODEL
    H = N_HEADS

    out, attn = pl.pallas_call(
        _decoder_kernel,
        grid=(B,),
        in_specs=[
            pl.BlockSpec((1, S, D), lambda b: (b, 0, 0)),             # x
            pl.BlockSpec((1, S, D), lambda b: (b, 0, 0)),             # enc_out
            pl.BlockSpec((1, 1, S, S), lambda b: (b, 0, 0, 0)),       # dec_mask
            pl.BlockSpec((1, 1, S, S), lambda b: (b, 0, 0, 0)),       # enc_dec_mask
            pl.BlockSpec((S, 2 * D), lambda b: (0, 0)),               # rope slab
            pl.BlockSpec((D_FF, SLAB_W), lambda b: (0, 0)),           # weight slab
            pl.BlockSpec((1, SLAB_W), lambda b: (0, 0)),              # bias slab
        ],
        out_specs=[
            pl.BlockSpec((1, S, D), lambda b: (b, 0, 0)),
            pl.BlockSpec((1, 2 * H, S, S), lambda b: (b, 0, 0, 0)),   # both attns
        ],
        out_shape=[
            jax.ShapeDtypeStruct((B, S, D), x.dtype),
            jax.ShapeDtypeStruct((B, 2 * H, S, S), jnp.float32),
        ],
        compiler_params=pltpu.CompilerParams(
            dimension_semantics=("parallel",)),
    )(x, enc_out, dec_mask, enc_dec_mask,
      packed['rope'], packed['w'], packed['b'])

    attn = attn.reshape(B, 2, H, S, S)
    return out, attn[:, 0], attn[:, 1]


# ============================ pure-JAX reference ==============================

def _ref_rmsnorm(x, g):
    ms = jnp.mean(x.astype(jnp.float32) ** 2, axis=-1, keepdims=True)
    return x * lax.rsqrt(ms + EPS) * g[0]


def _ref_rope(t, cos, sin):
    hd = t.shape[-1]
    t1, t2 = t[..., :hd // 2], t[..., hd // 2:]
    c, s = cos[None, None], sin[None, None]
    return jnp.concatenate([t1 * c - t2 * s, t1 * s + t2 * c], axis=-1)


def _ref_mha(q_in, kv_in, mask, cos, sin, p):
    B, S, _ = q_in.shape
    q = q_in @ p['wq'] + p['bq'][0]
    k = kv_in @ p['wk'] + p['bk'][0]
    v = kv_in @ p['wv'] + p['bv'][0]
    q = q.reshape(B, S, N_HEADS, HEAD_DIM).transpose(0, 2, 1, 3)
    k = k.reshape(B, S, N_HEADS, HEAD_DIM).transpose(0, 2, 1, 3)
    v = v.reshape(B, S, N_HEADS, HEAD_DIM).transpose(0, 2, 1, 3)
    q, k = _ref_rope(q, cos, sin), _ref_rope(k, cos, sin)
    sc = jnp.einsum('bhqd,bhkd->bhqk', q, k) / jnp.sqrt(jnp.float32(HEAD_DIM))
    sc = jnp.where(mask > 0.5, jnp.float32(MASK_FILL), sc)
    attn = jax.nn.softmax(sc, axis=-1)
    ctx = jnp.einsum('bhqk,bhkd->bhqd', attn, v)
    ctx = ctx.transpose(0, 2, 1, 3).reshape(B, S, D_MODEL)
    return ctx @ p['wo'] + p['bo'][0], attn


def _ref_forward(params, x, enc_out, dec_mask, enc_dec_mask):
    cos, sin = get_rotary_emb(x.shape[1], HEAD_DIM)
    g = params['norm_w']
    xn = _ref_rmsnorm(x, g)
    r, a_dec = _ref_mha(xn, xn, dec_mask, cos, sin, params['self'])
    x = x + r
    xn = _ref_rmsnorm(x, g)
    r, a_xd = _ref_mha(xn, enc_out, enc_dec_mask, cos, sin, params['cross'])
    x = x + r
    xn = _ref_rmsnorm(x, g)
    p = params['ff']
    h = jnp.maximum(xn @ p['w1'] + p['b1'][0], 0.0)
    x = x + (h @ p['w2'] + p['b2'][0])
    return x, a_dec, a_xd


# =================================== main =====================================

def _init_params(key):
    ks = jax.random.split(key, 16)

    def lin(kw, kb, din, dout):
        return (jax.random.normal(kw, (din, dout), jnp.float32) * 0.1,
                jax.random.normal(kb, (1, dout), jnp.float32) * 0.05)

    def mha_params(ks4):
        wq, bq = lin(ks4[0], ks4[0], D_MODEL, D_MODEL)
        wk, bk = lin(ks4[1], ks4[1], D_MODEL, D_MODEL)
        wv, bv = lin(ks4[2], ks4[2], D_MODEL, D_MODEL)
        wo, bo = lin(ks4[3], ks4[3], D_MODEL, D_MODEL)
        return dict(wq=wq, bq=bq, wk=wk, bk=bk, wv=wv, bv=bv, wo=wo, bo=bo)

    w1, b1 = lin(ks[8], ks[9], D_MODEL, D_FF)
    w2, b2 = lin(ks[10], ks[11], D_FF, D_MODEL)
    return dict(
        self=mha_params(ks[0:4]),
        cross=mha_params(ks[4:8]),
        ff=dict(w1=w1, b1=b1, w2=w2, b2=b2),
        norm_w=jnp.ones((1, D_MODEL), jnp.float32),
    )


if __name__ == "__main__":
    key = jax.random.PRNGKey(0)
    k_p, k_x, k_e = jax.random.split(key, 3)
    params = _init_params(k_p)
    packed = prepare_params(params, SEQ)      # one-time prep, hoisted out of forward

    x = jax.random.normal(k_x, (BATCH, SEQ, D_MODEL), jnp.float32)
    enc_out = jax.random.normal(k_e, (BATCH, SEQ, D_MODEL), jnp.float32)

    # causal decoder mask (1.0 == masked) as float32; no encoder padding mask
    causal = jnp.triu(jnp.ones((SEQ, SEQ), jnp.float32), k=1)
    dec_mask = jnp.broadcast_to(causal, (BATCH, 1, SEQ, SEQ)).astype(jnp.float32)
    enc_dec_mask = jnp.zeros((BATCH, 1, SEQ, SEQ), jnp.float32)

    out, atten_dec, atten_enc_dec = decoder_layer_forward(
        packed, x, enc_out, dec_mask, enc_dec_mask)
    jax.block_until_ready((out, atten_dec, atten_enc_dec))

    ref_out, ref_ad, ref_axd = _ref_forward(params, x, enc_out, dec_mask, enc_dec_mask)
    np.testing.assert_allclose(np.asarray(out), np.asarray(ref_out), rtol=1e-4, atol=1e-4)
    np.testing.assert_allclose(np.asarray(atten_dec), np.asarray(ref_ad), rtol=1e-4, atol=1e-4)
    np.testing.assert_allclose(np.asarray(atten_enc_dec), np.asarray(ref_axd), rtol=1e-4, atol=1e-4)

    print("KERNEL_OK")
</pallas_src>

<mosaic_0001>
module attributes {stable_mosaic.version = 11 : i64} {
  func.func @_decoder_kernel(%arg0: i32, %arg1: memref<1x8x32xf32, #tpu.memory_space<vmem>>, %arg2: memref<1x8x32xf32, #tpu.memory_space<vmem>>, %arg3: memref<1x1x8x8xf32, #tpu.memory_space<vmem>>, %arg4: memref<1x1x8x8xf32, #tpu.memory_space<vmem>>, %arg5: memref<8x64xf32, #tpu.memory_space<vmem>>, %arg6: memref<64x512xf32, #tpu.memory_space<vmem>>, %arg7: memref<1x512xf32, #tpu.memory_space<vmem>>, %arg8: memref<1x8x32xf32, #tpu.memory_space<vmem>>, %arg9: memref<1x8x8x8xf32, #tpu.memory_space<vmem>>) attributes {dimension_semantics = [#tpu.dimension_semantics<parallel>], iteration_bounds = array<i64: 2>, scalar_prefetch = 0 : i64, scratch_operands = 0 : i64, tpu.core_type = #tpu.core_type<tc>, window_params = [{transform_indices = @transform_0, window_bounds = array<i64: 1, 8, 32>}, {transform_indices = @transform_1, window_bounds = array<i64: 1, 8, 32>}, {transform_indices = @transform_2, window_bounds = array<i64: 1, 1, 8, 8>}, {transform_indices = @transform_3, window_bounds = array<i64: 1, 1, 8, 8>}, {pipeline_mode = #tpu.pipeline_mode<synchronous>, transform_indices = @transform_4, window_bounds = array<i64: 8, 64>}, {pipeline_mode = #tpu.pipeline_mode<synchronous>, transform_indices = @transform_5, window_bounds = array<i64: 64, 512>}, {pipeline_mode = #tpu.pipeline_mode<synchronous>, transform_indices = @transform_6, window_bounds = array<i64: 1, 512>}, {transform_indices = @transform_7, window_bounds = array<i64: 1, 8, 32>}, {transform_indices = @transform_8, window_bounds = array<i64: 1, 8, 8, 8>}]} {
    %c0 = arith.constant 0 : index
    %c0_0 = arith.constant 0 : index
    %c0_1 = arith.constant 0 : index
    %0 = vector.load %arg1[%c0, %c0_0, %c0_1] : memref<1x8x32xf32, #tpu.memory_space<vmem>>, vector<1x8x32xf32>
    %1 = vector.shape_cast %0 : vector<1x8x32xf32> to vector<8x32xf32>
    %c0_2 = arith.constant 0 : index
    %c0_3 = arith.constant 0 : index
    %c0_4 = arith.constant 0 : index
    %2 = vector.load %arg2[%c0_2, %c0_3, %c0_4] : memref<1x8x32xf32, #tpu.memory_space<vmem>>, vector<1x8x32xf32>
    %3 = vector.shape_cast %2 : vector<1x8x32xf32> to vector<8x32xf32>
    %c0_5 = arith.constant 0 : index
    %c0_6 = arith.constant 0 : index
    %4 = vector.load %arg5[%c0_5, %c0_6] : memref<8x64xf32, #tpu.memory_space<vmem>>, vector<8x32xf32>
    %c0_7 = arith.constant 0 : index
    %c32 = arith.constant 32 : index
    %5 = vector.load %arg5[%c0_7, %c32] : memref<8x64xf32, #tpu.memory_space<vmem>>, vector<8x32xf32>
    %c0_8 = arith.constant 0 : index
    %c480 = arith.constant 480 : index
    %6 = vector.load %arg7[%c0_8, %c480] : memref<1x512xf32, #tpu.memory_space<vmem>>, vector<1x32xf32>
    %7 = arith.mulf %1, %1 : vector<8x32xf32>
    %cst = arith.constant dense<0.000000e+00> : vector<8xf32>
    %8 = vector.multi_reduction <add>, %7, %cst [1] : vector<8x32xf32> to vector<8xf32>
    %9 = vector.shape_cast %8 : vector<8xf32> to vector<8x1xf32>
    %cst_9 = arith.constant 3.200000e+01 : f32
    %10 = vector.broadcast %cst_9 : f32 to vector<8x1xf32>
    %11 = arith.divf %9, %10 : vector<8x1xf32>
    %cst_10 = arith.constant 9.99999997E-7 : f32
    %12 = vector.broadcast %cst_10 : f32 to vector<8x1xf32>
    %13 = arith.addf %11, %12 : vector<8x1xf32>
    %14 = math.rsqrt %13 : vector<8x1xf32>
    %15 = vector.broadcast %14 : vector<8x1xf32> to vector<8x32xf32>
    %16 = arith.mulf %1, %15 : vector<8x32xf32>
    %17 = vector.broadcast %6 : vector<1x32xf32> to vector<8x32xf32>
    %18 = arith.mulf %16, %17 : vector<8x32xf32>
    %c0_11 = arith.constant 0 : index
    %c0_12 = arith.constant 0 : index
    %19 = vector.load %arg6[%c0_11, %c0_12] : memref<64x512xf32, #tpu.memory_space<vmem>>, vector<32x160xf32>
    %cst_13 = arith.constant dense<0.000000e+00> : vector<8x160xf32>
    %20 = tpu.matmul %18, %19, %cst_13 {dimension_numbers = #tpu.dot_dimension_numbers<[1], [0], [0], [1], [0, 0, 1, 1], [], []>} : vector<8x32xf32>, vector<32x160xf32>, vector<8x160xf32> -> vector<8x160xf32>
    %c0_14 = arith.constant 0 : index
    %c0_15 = arith.constant 0 : index
    %21 = vector.load %arg7[%c0_14, %c0_15] : memref<1x512xf32, #tpu.memory_space<vmem>>, vector<1x160xf32>
    %22 = vector.broadcast %21 : vector<1x160xf32> to vector<8x160xf32>
    %23 = arith.addf %20, %22 : vector<8x160xf32>
    %24 = vector.extract_strided_slice %23 {offsets = [0, 0], sizes = [8, 64], strides = [1, 1]} : vector<8x160xf32> to vector<8x64xf32>
    %25 = vector.extract_strided_slice %24 {offsets = [0, 0], sizes = [8, 32], strides = [1, 1]} : vector<8x64xf32> to vector<8x32xf32>
    %26 = arith.mulf %25, %4 : vector<8x32xf32>
    %27 = vector.extract_strided_slice %24 {offsets = [0, 32], sizes = [8, 32], strides = [1, 1]} : vector<8x64xf32> to vector<8x32xf32>
    %28 = arith.mulf %27, %5 : vector<8x32xf32>
    %29 = arith.addf %26, %28 : vector<8x32xf32>
    %30 = vector.extract_strided_slice %23 {offsets = [0, 64], sizes = [8, 96], strides = [1, 1]} : vector<8x160xf32> to vector<8x96xf32>
    %31 = vector.extract_strided_slice %30 {offsets = [0, 0], sizes = [8, 32], strides = [1, 1]} : vector<8x96xf32> to vector<8x32xf32>
    %32 = arith.mulf %31, %4 : vector<8x32xf32>
    %33 = vector.extract_strided_slice %30 {offsets = [0, 64], sizes = [8, 32], strides = [1, 1]} : vector<8x96xf32> to vector<8x32xf32>
    %34 = arith.mulf %33, %5 : vector<8x32xf32>
    %35 = arith.addf %32, %34 : vector<8x32xf32>
    %36 = vector.extract_strided_slice %30 {offsets = [0, 32], sizes = [8, 32], strides = [1, 1]} : vector<8x96xf32> to vector<8x32xf32>
    %c0_16 = arith.constant 0 : index
    %c0_17 = arith.constant 0 : index
    %c0_18 = arith.constant 0 : index
    %c0_19 = arith.constant 0 : index
    %37 = vector.load %arg3[%c0_16, %c0_17, %c0_18, %c0_19] : memref<1x1x8x8xf32, #tpu.memory_space<vmem>>, vector<1x1x8x8xf32>
    %38 = vector.shape_cast %37 : vector<1x1x8x8xf32> to vector<8x8xf32>
    %cst_20 = arith.constant 5.000000e-01 : f32
    %39 = vector.broadcast %cst_20 : f32 to vector<8x8xf32>
    %40 = arith.cmpf ogt, %38, %39 : vector<8x8xf32>
    %c0_21 = arith.constant 0 : index
    %c160 = arith.constant 160 : index
    %41 = vector.load %arg6[%c0_21, %c160] : memref<64x512xf32, #tpu.memory_space<vmem>>, vector<32x32xf32>
    %c0_22 = arith.constant 0 : index
    %c160_23 = arith.constant 160 : index
    %42 = vector.load %arg7[%c0_22, %c160_23] : memref<1x512xf32, #tpu.memory_space<vmem>>, vector<1x32xf32>
    %cst_24 = arith.constant 0.000000e+00 : f32
    %43 = vector.broadcast %cst_24 : f32 to vector<8x32xf32>
    %44 = vector.extract_strided_slice %29 {offsets = [0, 0], sizes = [8, 8], strides = [1, 1]} : vector<8x32xf32> to vector<8x8xf32>
    %45 = vector.extract_strided_slice %35 {offsets = [0, 0], sizes = [8, 8], strides = [1, 1]} : vector<8x32xf32> to vector<8x8xf32>
    %46 = vector.extract_strided_slice %36 {offsets = [0, 0], sizes = [8, 8], strides = [1, 1]} : vector<8x32xf32> to vector<8x8xf32>
    %cst_25 = arith.constant dense<0.000000e+00> : vector<8x8xf32>
    %47 = tpu.matmul %44, %45, %cst_25 {dimension_numbers = #tpu.dot_dimension_numbers<[1], [1], [0], [0], [0, 0, 1, 0], [], []>} : vector<8x8xf32>, vector<8x8xf32>, vector<8x8xf32> -> vector<8x8xf32>
    %cst_26 = arith.constant -1.000000e+10 : f32
    %48 = vector.broadcast %cst_26 : f32 to vector<8x8xf32>
    %49 = arith.select %40, %48, %47 : vector<8x8xi1>, vector<8x8xf32>
    %cst_27 = arith.constant dense<0xFF800000> : vector<8xf32>
    %50 = vector.multi_reduction <maximumf>, %49, %cst_27 [1] : vector<8x8xf32> to vector<8xf32>
    %51 = vector.shape_cast %50 : vector<8xf32> to vector<8x1xf32>
    %52 = vector.broadcast %51 : vector<8x1xf32> to vector<8x8xf32>
    %53 = arith.subf %49, %52 : vector<8x8xf32>
    %54 = math.exp %53 : vector<8x8xf32>
    %cst_28 = arith.constant dense<0.000000e+00> : vector<8xf32>
    %55 = vector.multi_reduction <add>, %54, %cst_28 [1] : vector<8x8xf32> to vector<8xf32>
    %56 = vector.shape_cast %55 : vector<8xf32> to vector<8x1xf32>
    %57 = tpu.reciprocal %56 : vector<8x1xf32> -> vector<8x1xf32>
    %58 = vector.broadcast %57 : vector<8x1xf32> to vector<8x8xf32>
    %59 = arith.mulf %54, %58 : vector<8x8xf32>
    %c0_29 = arith.constant 0 : index
    %c0_30 = arith.constant 0 : index
    %c0_31 = arith.constant 0 : index
    %c0_32 = arith.constant 0 : index
    %60 = vector.load %arg9[%c0_29, %c0_30, %c0_31, %c0_32] : memref<1x8x8x8xf32, #tpu.memory_space<vmem>>, vector<1x1x8x8xf32>
    %61 = vector.shape_cast %60 : vector<1x1x8x8xf32> to vector<8x8xf32>
    %62 = vector.shape_cast %59 : vector<8x8xf32> to vector<1x1x8x8xf32>
    tpu.vector_store %arg9[%c0_29, %c0_30, %c0_31, %c0_32], %62 {strides = array<i32>} : memref<1x8x8x8xf32, #tpu.memory_space<vmem>>, vector<1x1x8x8xf32>,
    %cst_33 = arith.constant dense<0.000000e+00> : vector<8x8xf32>
    %63 = tpu.matmul %59, %46, %cst_33 {dimension_numbers = #tpu.dot_dimension_numbers<[1], [0], [0], [1], [0, 0, 1, 1], [], []>} : vector<8x8xf32>, vector<8x8xf32>, vector<8x8xf32> -> vector<8x8xf32>
    %64 = vector.extract_strided_slice %41 {offsets = [0, 0], sizes = [8, 32], strides = [1, 1]} : vector<32x32xf32> to vector<8x32xf32>
    %cst_34 = arith.constant dense<0.000000e+00> : vector<8x32xf32>
    %65 = tpu.matmul %63, %64, %cst_34 {dimension_numbers = #tpu.dot_dimension_numbers<[1], [0], [0], [1], [0, 0, 1, 1], [], []>} : vector<8x8xf32>, vector<8x32xf32>, vector<8x32xf32> -> vector<8x32xf32>
    %66 = arith.addf %43, %65 : vector<8x32xf32>
    %67 = vector.extract_strided_slice %29 {offsets = [0, 8], sizes = [8, 8], strides = [1, 1]} : vector<8x32xf32> to vector<8x8xf32>
    %68 = vector.extract_strided_slice %35 {offsets = [0, 8], sizes = [8, 8], strides = [1, 1]} : vector<8x32xf32> to vector<8x8xf32>
    %69 = vector.extract_strided_slice %36 {offsets = [0, 8], sizes = [8, 8], strides = [1, 1]} : vector<8x32xf32> to vector<8x8xf32>
    %cst_35 = arith.constant dense<0.000000e+00> : vector<8x8xf32>
    %70 = tpu.matmul %67, %68, %cst_35 {dimension_numbers = #tpu.dot_dimension_numbers<[1], [1], [0], [0], [0, 0, 1, 0], [], []>} : vector<8x8xf32>, vector<8x8xf32>, vector<8x8xf32> -> vector<8x8xf32>
    %cst_36 = arith.constant -1.000000e+10 : f32
    %71 = vector.broadcast %cst_36 : f32 to vector<8x8xf32>
    %72 = arith.select %40, %71, %70 : vector<8x8xi1>, vector<8x8xf32>
    %cst_37 = arith.constant dense<0xFF800000> : vector<8xf32>
    %73 = vector.multi_reduction <maximumf>, %72, %cst_37 [1] : vector<8x8xf32> to vector<8xf32>
    %74 = vector.shape_cast %73 : vector<8xf32> to vector<8x1xf32>
    %75 = vector.broadcast %74 : vector<8x1xf32> to vector<8x8xf32>
    %76 = arith.subf %72, %75 : vector<8x8xf32>
    %77 = math.exp %76 : vector<8x8xf32>
    %cst_38 = arith.constant dense<0.000000e+00> : vector<8xf32>
    %78 = vector.multi_reduction <add>, %77, %cst_38 [1] : vector<8x8xf32> to vector<8xf32>
    %79 = vector.shape_cast %78 : vector<8xf32> to vector<8x1xf32>
    %80 = tpu.reciprocal %79 : vector<8x1xf32> -> vector<8x1xf32>
    %81 = vector.broadcast %80 : vector<8x1xf32> to vector<8x8xf32>
    %82 = arith.mulf %77, %81 : vector<8x8xf32>
    %c0_39 = arith.constant 0 : index
    %c1 = arith.constant 1 : index
    %c0_40 = arith.constant 0 : index
    %c0_41 = arith.constant 0 : index
    %83 = vector.load %arg9[%c0_39, %c1, %c0_40, %c0_41] : memref<1x8x8x8xf32, #tpu.memory_space<vmem>>, vector<1x1x8x8xf32>
    %84 = vector.shape_cast %83 : vector<1x1x8x8xf32> to vector<8x8xf32>
    %85 = vector.shape_cast %82 : vector<8x8xf32> to vector<1x1x8x8xf32>
    tpu.vector_store %arg9[%c0_39, %c1, %c0_40, %c0_41], %85 {strides = array<i32>} : memref<1x8x8x8xf32, #tpu.memory_space<vmem>>, vector<1x1x8x8xf32>,
    %cst_42 = arith.constant dense<0.000000e+00> : vector<8x8xf32>
    %86 = tpu.matmul %82, %69, %cst_42 {dimension_numbers = #tpu.dot_dimension_numbers<[1], [0], [0], [1], [0, 0, 1, 1], [], []>} : vector<8x8xf32>, vector<8x8xf32>, vector<8x8xf32> -> vector<8x8xf32>
    %87 = vector.extract_strided_slice %41 {offsets = [8, 0], sizes = [8, 32], strides = [1, 1]} : vector<32x32xf32> to vector<8x32xf32>
    %cst_43 = arith.constant dense<0.000000e+00> : vector<8x32xf32>
    %88 = tpu.matmul %86, %87, %cst_43 {dimension_numbers = #tpu.dot_dimension_numbers<[1], [0], [0], [1], [0, 0, 1, 1], [], []>} : vector<8x8xf32>, vector<8x32xf32>, vector<8x32xf32> -> vector<8x32xf32>
    %89 = arith.addf %66, %88 : vector<8x32xf32>
    %90 = vector.extract_strided_slice %29 {offsets = [0, 16], sizes = [8, 8], strides = [1, 1]} : vector<8x32xf32> to vector<8x8xf32>
    %91 = vector.extract_strided_slice %35 {offsets = [0, 16], sizes = [8, 8], strides = [1, 1]} : vector<8x32xf32> to vector<8x8xf32>
    %92 = vector.extract_strided_slice %36 {offsets = [0, 16], sizes = [8, 8], strides = [1, 1]} : vector<8x32xf32> to vector<8x8xf32>
    %cst_44 = arith.constant dense<0.000000e+00> : vector<8x8xf32>
    %93 = tpu.matmul %90, %91, %cst_44 {dimension_numbers = #tpu.dot_dimension_numbers<[1], [1], [0], [0], [0, 0, 1, 0], [], []>} : vector<8x8xf32>, vector<8x8xf32>, vector<8x8xf32> -> vector<8x8xf32>
    %cst_45 = arith.constant -1.000000e+10 : f32
    %94 = vector.broadcast %cst_45 : f32 to vector<8x8xf32>
    %95 = arith.select %40, %94, %93 : vector<8x8xi1>, vector<8x8xf32>
    %cst_46 = arith.constant dense<0xFF800000> : vector<8xf32>
    %96 = vector.multi_reduction <maximumf>, %95, %cst_46 [1] : vector<8x8xf32> to vector<8xf32>
    %97 = vector.shape_cast %96 : vector<8xf32> to vector<8x1xf32>
    %98 = vector.broadcast %97 : vector<8x1xf32> to vector<8x8xf32>
    %99 = arith.subf %95, %98 : vector<8x8xf32>
    %100 = math.exp %99 : vector<8x8xf32>
    %cst_47 = arith.constant dense<0.000000e+00> : vector<8xf32>
    %101 = vector.multi_reduction <add>, %100, %cst_47 [1] : vector<8x8xf32> to vector<8xf32>
    %102 = vector.shape_cast %101 : vector<8xf32> to vector<8x1xf32>
    %103 = tpu.reciprocal %102 : vector<8x1xf32> -> vector<8x1xf32>
    %104 = vector.broadcast %103 : vector<8x1xf32> to vector<8x8xf32>
    %105 = arith.mulf %100, %104 : vector<8x8xf32>
    %c0_48 = arith.constant 0 : index
    %c2 = arith.constant 2 : index
    %c0_49 = arith.constant 0 : index
    %c0_50 = arith.constant 0 : index
    %106 = vector.load %arg9[%c0_48, %c2, %c0_49, %c0_50] : memref<1x8x8x8xf32, #tpu.memory_space<vmem>>, vector<1x1x8x8xf32>
    %107 = vector.shape_cast %106 : vector<1x1x8x8xf32> to vector<8x8xf32>
    %108 = vector.shape_cast %105 : vector<8x8xf32> to vector<1x1x8x8xf32>
    tpu.vector_store %arg9[%c0_48, %c2, %c0_49, %c0_50], %108 {strides = array<i32>} : memref<1x8x8x8xf32, #tpu.memory_space<vmem>>, vector<1x1x8x8xf32>,
    %cst_51 = arith.constant dense<0.000000e+00> : vector<8x8xf32>
    %109 = tpu.matmul %105, %92, %cst_51 {dimension_numbers = #tpu.dot_dimension_numbers<[1], [0], [0], [1], [0, 0, 1, 1], [], []>} : vector<8x8xf32>, vector<8x8xf32>, vector<8x8xf32> -> vector<8x8xf32>
    %110 = vector.extract_strided_slice %41 {offsets = [16, 0], sizes = [8, 32], strides = [1, 1]} : vector<32x32xf32> to vector<8x32xf32>
    %cst_52 = arith.constant dense<0.000000e+00> : vector<8x32xf32>
    %111 = tpu.matmul %109, %110, %cst_52 {dimension_numbers = #tpu.dot_dimension_numbers<[1], [0], [0], [1], [0, 0, 1, 1], [], []>} : vector<8x8xf32>, vector<8x32xf32>, vector<8x32xf32> -> vector<8x32xf32>
    %112 = arith.addf %89, %111 : vector<8x32xf32>
    %113 = vector.extract_strided_slice %29 {offsets = [0, 24], sizes = [8, 8], strides = [1, 1]} : vector<8x32xf32> to vector<8x8xf32>
    %114 = vector.extract_strided_slice %35 {offsets = [0, 24], sizes = [8, 8], strides = [1, 1]} : vector<8x32xf32> to vector<8x8xf32>
    %115 = vector.extract_strided_slice %36 {offsets = [0, 24], sizes = [8, 8], strides = [1, 1]} : vector<8x32xf32> to vector<8x8xf32>
    %cst_53 = arith.constant dense<0.000000e+00> : vector<8x8xf32>
    %116 = tpu.matmul %113, %114, %cst_53 {dimension_numbers = #tpu.dot_dimension_numbers<[1], [1], [0], [0], [0, 0, 1, 0], [], []>} : vector<8x8xf32>, vector<8x8xf32>, vector<8x8xf32> -> vector<8x8xf32>
    %cst_54 = arith.constant -1.000000e+10 : f32
    %117 = vector.broadcast %cst_54 : f32 to vector<8x8xf32>
    %118 = arith.select %40, %117, %116 : vector<8x8xi1>, vector<8x8xf32>
    %cst_55 = arith.constant dense<0xFF800000> : vector<8xf32>
    %119 = vector.multi_reduction <maximumf>, %118, %cst_55 [1] : vector<8x8xf32> to vector<8xf32>
    %120 = vector.shape_cast %119 : vector<8xf32> to vector<8x1xf32>
    %121 = vector.broadcast %120 : vector<8x1xf32> to vector<8x8xf32>
    %122 = arith.subf %118, %121 : vector<8x8xf32>
    %123 = math.exp %122 : vector<8x8xf32>
    %cst_56 = arith.constant dense<0.000000e+00> : vector<8xf32>
    %124 = vector.multi_reduction <add>, %123, %cst_56 [1] : vector<8x8xf32> to vector<8xf32>
    %125 = vector.shape_cast %124 : vector<8xf32> to vector<8x1xf32>
    %126 = tpu.reciprocal %125 : vector<8x1xf32> -> vector<8x1xf32>
    %127 = vector.broadcast %126 : vector<8x1xf32> to vector<8x8xf32>
    %128 = arith.mulf %123, %127 : vector<8x8xf32>
    %c0_57 = arith.constant 0 : index
    %c3 = arith.constant 3 : index
    %c0_58 = arith.constant 0 : index
    %c0_59 = arith.constant 0 : index
    %129 = vector.load %arg9[%c0_57, %c3, %c0_58, %c0_59] : memref<1x8x8x8xf32, #tpu.memory_space<vmem>>, vector<1x1x8x8xf32>
    %130 = vector.shape_cast %129 : vector<1x1x8x8xf32> to vector<8x8xf32>
    %131 = vector.shape_cast %128 : vector<8x8xf32> to vector<1x1x8x8xf32>
    tpu.vector_store %arg9[%c0_57, %c3, %c0_58, %c0_59], %131 {strides = array<i32>} : memref<1x8x8x8xf32, #tpu.memory_space<vmem>>, vector<1x1x8x8xf32>,
    %cst_60 = arith.constant dense<0.000000e+00> : vector<8x8xf32>
    %132 = tpu.matmul %128, %115, %cst_60 {dimension_numbers = #tpu.dot_dimension_numbers<[1], [0], [0], [1], [0, 0, 1, 1], [], []>} : vector<8x8xf32>, vector<8x8xf32>, vector<8x8xf32> -> vector<8x8xf32>
    %133 = vector.extract_strided_slice %41 {offsets = [24, 0], sizes = [8, 32], strides = [1, 1]} : vector<32x32xf32> to vector<8x32xf32>
    %cst_61 = arith.constant dense<0.000000e+00> : vector<8x32xf32>
    %134 = tpu.matmul %132, %133, %cst_61 {dimension_numbers = #tpu.dot_dimension_numbers<[1], [0], [0], [1], [0, 0, 1, 1], [], []>} : vector<8x8xf32>, vector<8x32xf32>, vector<8x32xf32> -> vector<8x32xf32>
    %135 = arith.addf %112, %134 : vector<8x32xf32>
    %136 = vector.broadcast %42 : vector<1x32xf32> to vector<8x32xf32>
    %137 = arith.addf %135, %136 : vector<8x32xf32>
    %138 = arith.addf %1, %137 : vector<8x32xf32>
    %139 = arith.mulf %138, %138 : vector<8x32xf32>
    %cst_62 = arith.constant dense<0.000000e+00> : vector<8xf32>
    %140 = vector.multi_reduction <add>, %139, %cst_62 [1] : vector<8x32xf32> to vector<8xf32>
    %141 = vector.shape_cast %140 : vector<8xf32> to vector<8x1xf32>
    %cst_63 = arith.constant 3.200000e+01 : f32
    %142 = vector.broadcast %cst_63 : f32 to vector<8x1xf32>
    %143 = arith.divf %141, %142 : vector<8x1xf32>
    %cst_64 = arith.constant 9.99999997E-7 : f32
    %144 = vector.broadcast %cst_64 : f32 to vector<8x1xf32>
    %145 = arith.addf %143, %144 : vector<8x1xf32>
    %146 = math.rsqrt %145 : vector<8x1xf32>
    %147 = vector.broadcast %146 : vector<8x1xf32> to vector<8x32xf32>
    %148 = arith.mulf %138, %147 : vector<8x32xf32>
    %149 = vector.broadcast %6 : vector<1x32xf32> to vector<8x32xf32>
    %150 = arith.mulf %148, %149 : vector<8x32xf32>
    %c0_65 = arith.constant 0 : index
    %c192 = arith.constant 192 : index
    %151 = vector.load %arg6[%c0_65, %c192] : memref<64x512xf32, #tpu.memory_space<vmem>>, vector<32x64xf32>
    %cst_66 = arith.constant dense<0.000000e+00> : vector<8x64xf32>
    %152 = tpu.matmul %150, %151, %cst_66 {dimension_numbers = #tpu.dot_dimension_numbers<[1], [0], [0], [1], [0, 0, 1, 1], [], []>} : vector<8x32xf32>, vector<32x64xf32>, vector<8x64xf32> -> vector<8x64xf32>
    %c0_67 = arith.constant 0 : index
    %c192_68 = arith.constant 192 : index
    %153 = vector.load %arg7[%c0_67, %c192_68] : memref<1x512xf32, #tpu.memory_space<vmem>>, vector<1x64xf32>
    %154 = vector.broadcast %153 : vector<1x64xf32> to vector<8x64xf32>
    %155 = arith.addf %152, %154 : vector<8x64xf32>
    %c0_69 = arith.constant 0 : index
    %c256 = arith.constant 256 : index
    %156 = vector.load %arg6[%c0_69, %c256] : memref<64x512xf32, #tpu.memory_space<vmem>>, vector<32x96xf32>
    %cst_70 = arith.constant dense<0.000000e+00> : vector<8x96xf32>
    %157 = tpu.matmul %3, %156, %cst_70 {dimension_numbers = #tpu.dot_dimension_numbers<[1], [0], [0], [1], [0, 0, 1, 1], [], []>} : vector<8x32xf32>, vector<32x96xf32>, vector<8x96xf32> -> vector<8x96xf32>
    %c0_71 = arith.constant 0 : index
    %c256_72 = arith.constant 256 : index
    %158 = vector.load %arg7[%c0_71, %c256_72] : memref<1x512xf32, #tpu.memory_space<vmem>>, vector<1x96xf32>
    %159 = vector.broadcast %158 : vector<1x96xf32> to vector<8x96xf32>
    %160 = arith.addf %157, %159 : vector<8x96xf32>
    %161 = vector.extract_strided_slice %155 {offsets = [0, 0], sizes = [8, 32], strides = [1, 1]} : vector<8x64xf32> to vector<8x32xf32>
    %162 = arith.mulf %161, %4 : vector<8x32xf32>
    %163 = vector.extract_strided_slice %155 {offsets = [0, 32], sizes = [8, 32], strides = [1, 1]} : vector<8x64xf32> to vector<8x32xf32>
    %164 = arith.mulf %163, %5 : vector<8x32xf32>
    %165 = arith.addf %162, %164 : vector<8x32xf32>
    %166 = vector.extract_strided_slice %160 {offsets = [0, 0], sizes = [8, 32], strides = [1, 1]} : vector<8x96xf32> to vector<8x32xf32>
    %167 = arith.mulf %166, %4 : vector<8x32xf32>
    %168 = vector.extract_strided_slice %160 {offsets = [0, 64], sizes = [8, 32], strides = [1, 1]} : vector<8x96xf32> to vector<8x32xf32>
    %169 = arith.mulf %168, %5 : vector<8x32xf32>
    %170 = arith.addf %167, %169 : vector<8x32xf32>
    %171 = vector.extract_strided_slice %160 {offsets = [0, 32], sizes = [8, 32], strides = [1, 1]} : vector<8x96xf32> to vector<8x32xf32>
    %c0_73 = arith.constant 0 : index
    %c0_74 = arith.constant 0 : index
    %c0_75 = arith.constant 0 : index
    %c0_76 = arith.constant 0 : index
    %172 = vector.load %arg4[%c0_73, %c0_74, %c0_75, %c0_76] : memref<1x1x8x8xf32, #tpu.memory_space<vmem>>, vector<1x1x8x8xf32>
    %173 = vector.shape_cast %172 : vector<1x1x8x8xf32> to vector<8x8xf32>
    %cst_77 = arith.constant 5.000000e-01 : f32
    %174 = vector.broadcast %cst_77 : f32 to vector<8x8xf32>
    %175 = arith.cmpf ogt, %173, %174 : vector<8x8xf32>
    %c0_78 = arith.constant 0 : index
    %c352 = arith.constant 352 : index
    %176 = vector.load %arg6[%c0_78, %c352] : memref<64x512xf32, #tpu.memory_space<vmem>>, vector<32x32xf32>
    %c0_79 = arith.constant 0 : index
    %c352_80 = arith.constant 352 : index
    %177 = vector.load %arg7[%c0_79, %c352_80] : memref<1x512xf32, #tpu.memory_space<vmem>>, vector<1x32xf32>
    %cst_81 = arith.constant 0.000000e+00 : f32
    %178 = vector.broadcast %cst_81 : f32 to vector<8x32xf32>
    %179 = vector.extract_strided_slice %165 {offsets = [0, 0], sizes = [8, 8], strides = [1, 1]} : vector<8x32xf32> to vector<8x8xf32>
    %180 = vector.extract_strided_slice %170 {offsets = [0, 0], sizes = [8, 8], strides = [1, 1]} : vector<8x32xf32> to vector<8x8xf32>
    %181 = vector.extract_strided_slice %171 {offsets = [0, 0], sizes = [8, 8], strides = [1, 1]} : vector<8x32xf32> to vector<8x8xf32>
    %cst_82 = arith.constant dense<0.000000e+00> : vector<8x8xf32>
    %182 = tpu.matmul %179, %180, %cst_82 {dimension_numbers = #tpu.dot_dimension_numbers<[1], [1], [0], [0], [0, 0, 1, 0], [], []>} : vector<8x8xf32>, vector<8x8xf32>, vector<8x8xf32> -> vector<8x8xf32>
    %cst_83 = arith.constant -1.000000e+10 : f32
    %183 = vector.broadcast %cst_83 : f32 to vector<8x8xf32>
    %184 = arith.select %175, %183, %182 : vector<8x8xi1>, vector<8x8xf32>
    %cst_84 = arith.constant dense<0xFF800000> : vector<8xf32>
    %185 = vector.multi_reduction <maximumf>, %184, %cst_84 [1] : vector<8x8xf32> to vector<8xf32>
    %186 = vector.shape_cast %185 : vector<8xf32> to vector<8x1xf32>
    %187 = vector.broadcast %186 : vector<8x1xf32> to vector<8x8xf32>
    %188 = arith.subf %184, %187 : vector<8x8xf32>
    %189 = math.exp %188 : vector<8x8xf32>
    %cst_85 = arith.constant dense<0.000000e+00> : vector<8xf32>
    %190 = vector.multi_reduction <add>, %189, %cst_85 [1] : vector<8x8xf32> to vector<8xf32>
    %191 = vector.shape_cast %190 : vector<8xf32> to vector<8x1xf32>
    %192 = tpu.reciprocal %191 : vector<8x1xf32> -> vector<8x1xf32>
    %193 = vector.broadcast %192 : vector<8x1xf32> to vector<8x8xf32>
    %194 = arith.mulf %189, %193 : vector<8x8xf32>
    %c0_86 = arith.constant 0 : index
    %c4 = arith.constant 4 : index
    %c0_87 = arith.constant 0 : index
    %c0_88 = arith.constant 0 : index
    %195 = vector.load %arg9[%c0_86, %c4, %c0_87, %c0_88] : memref<1x8x8x8xf32, #tpu.memory_space<vmem>>, vector<1x1x8x8xf32>
    %196 = vector.shape_cast %195 : vector<1x1x8x8xf32> to vector<8x8xf32>
    %197 = vector.shape_cast %194 : vector<8x8xf32> to vector<1x1x8x8xf32>
    tpu.vector_store %arg9[%c0_86, %c4, %c0_87, %c0_88], %197 {strides = array<i32>} : memref<1x8x8x8xf32, #tpu.memory_space<vmem>>, vector<1x1x8x8xf32>,
    %cst_89 = arith.constant dense<0.000000e+00> : vector<8x8xf32>
    %198 = tpu.matmul %194, %181, %cst_89 {dimension_numbers = #tpu.dot_dimension_numbers<[1], [0], [0], [1], [0, 0, 1, 1], [], []>} : vector<8x8xf32>, vector<8x8xf32>, vector<8x8xf32> -> vector<8x8xf32>
    %199 = vector.extract_strided_slice %176 {offsets = [0, 0], sizes = [8, 32], strides = [1, 1]} : vector<32x32xf32> to vector<8x32xf32>
    %cst_90 = arith.constant dense<0.000000e+00> : vector<8x32xf32>
    %200 = tpu.matmul %198, %199, %cst_90 {dimension_numbers = #tpu.dot_dimension_numbers<[1], [0], [0], [1], [0, 0, 1, 1], [], []>} : vector<8x8xf32>, vector<8x32xf32>, vector<8x32xf32> -> vector<8x32xf32>
    %201 = arith.addf %178, %200 : vector<8x32xf32>
    %202 = vector.extract_strided_slice %165 {offsets = [0, 8], sizes = [8, 8], strides = [1, 1]} : vector<8x32xf32> to vector<8x8xf32>
    %203 = vector.extract_strided_slice %170 {offsets = [0, 8], sizes = [8, 8], strides = [1, 1]} : vector<8x32xf32> to vector<8x8xf32>
    %204 = vector.extract_strided_slice %171 {offsets = [0, 8], sizes = [8, 8], strides = [1, 1]} : vector<8x32xf32> to vector<8x8xf32>
    %cst_91 = arith.constant dense<0.000000e+00> : vector<8x8xf32>
    %205 = tpu.matmul %202, %203, %cst_91 {dimension_numbers = #tpu.dot_dimension_numbers<[1], [1], [0], [0], [0, 0, 1, 0], [], []>} : vector<8x8xf32>, vector<8x8xf32>, vector<8x8xf32> -> vector<8x8xf32>
    %cst_92 = arith.constant -1.000000e+10 : f32
    %206 = vector.broadcast %cst_92 : f32 to vector<8x8xf32>
    %207 = arith.select %175, %206, %205 : vector<8x8xi1>, vector<8x8xf32>
    %cst_93 = arith.constant dense<0xFF800000> : vector<8xf32>
    %208 = vector.multi_reduction <maximumf>, %207, %cst_93 [1] : vector<8x8xf32> to vector<8xf32>
    %209 = vector.shape_cast %208 : vector<8xf32> to vector<8x1xf32>
    %210 = vector.broadcast %209 : vector<8x1xf32> to vector<8x8xf32>
    %211 = arith.subf %207, %210 : vector<8x8xf32>
    %212 = math.exp %211 : vector<8x8xf32>
    %cst_94 = arith.constant dense<0.000000e+00> : vector<8xf32>
    %213 = vector.multi_reduction <add>, %212, %cst_94 [1] : vector<8x8xf32> to vector<8xf32>
    %214 = vector.shape_cast %213 : vector<8xf32> to vector<8x1xf32>
    %215 = tpu.reciprocal %214 : vector<8x1xf32> -> vector<8x1xf32>
    %216 = vector.broadcast %215 : vector<8x1xf32> to vector<8x8xf32>
    %217 = arith.mulf %212, %216 : vector<8x8xf32>
    %c0_95 = arith.constant 0 : index
    %c5 = arith.constant 5 : index
    %c0_96 = arith.constant 0 : index
    %c0_97 = arith.constant 0 : index
    %218 = vector.load %arg9[%c0_95, %c5, %c0_96, %c0_97] : memref<1x8x8x8xf32, #tpu.memory_space<vmem>>, vector<1x1x8x8xf32>
    %219 = vector.shape_cast %218 : vector<1x1x8x8xf32> to vector<8x8xf32>
    %220 = vector.shape_cast %217 : vector<8x8xf32> to vector<1x1x8x8xf32>
    tpu.vector_store %arg9[%c0_95, %c5, %c0_96, %c0_97], %220 {strides = array<i32>} : memref<1x8x8x8xf32, #tpu.memory_space<vmem>>, vector<1x1x8x8xf32>,
    %cst_98 = arith.constant dense<0.000000e+00> : vector<8x8xf32>
    %221 = tpu.matmul %217, %204, %cst_98 {dimension_numbers = #tpu.dot_dimension_numbers<[1], [0], [0], [1], [0, 0, 1, 1], [], []>} : vector<8x8xf32>, vector<8x8xf32>, vector<8x8xf32> -> vector<8x8xf32>
    %222 = vector.extract_strided_slice %176 {offsets = [8, 0], sizes = [8, 32], strides = [1, 1]} : vector<32x32xf32> to vector<8x32xf32>
    %cst_99 = arith.constant dense<0.000000e+00> : vector<8x32xf32>
    %223 = tpu.matmul %221, %222, %cst_99 {dimension_numbers = #tpu.dot_dimension_numbers<[1], [0], [0], [1], [0, 0, 1, 1], [], []>} : vector<8x8xf32>, vector<8x32xf32>, vector<8x32xf32> -> vector<8x32xf32>
    %224 = arith.addf %201, %223 : vector<8x32xf32>
    %225 = vector.extract_strided_slice %165 {offsets = [0, 16], sizes = [8, 8], strides = [1, 1]} : vector<8x32xf32> to vector<8x8xf32>
    %226 = vector.extract_strided_slice %170 {offsets = [0, 16], sizes = [8, 8], strides = [1, 1]} : vector<8x32xf32> to vector<8x8xf32>
    %227 = vector.extract_strided_slice %171 {offsets = [0, 16], sizes = [8, 8], strides = [1, 1]} : vector<8x32xf32> to vector<8x8xf32>
    %cst_100 = arith.constant dense<0.000000e+00> : vector<8x8xf32>
    %228 = tpu.matmul %225, %226, %cst_100 {dimension_numbers = #tpu.dot_dimension_numbers<[1], [1], [0], [0], [0, 0, 1, 0], [], []>} : vector<8x8xf32>, vector<8x8xf32>, vector<8x8xf32> -> vector<8x8xf32>
    %cst_101 = arith.constant -1.000000e+10 : f32
    %229 = vector.broadcast %cst_101 : f32 to vector<8x8xf32>
    %230 = arith.select %175, %229, %228 : vector<8x8xi1>, vector<8x8xf32>
    %cst_102 = arith.constant dense<0xFF800000> : vector<8xf32>
    %231 = vector.multi_reduction <maximumf>, %230, %cst_102 [1] : vector<8x8xf32> to vector<8xf32>
    %232 = vector.shape_cast %231 : vector<8xf32> to vector<8x1xf32>
    %233 = vector.broadcast %232 : vector<8x1xf32> to vector<8x8xf32>
    %234 = arith.subf %230, %233 : vector<8x8xf32>
    %235 = math.exp %234 : vector<8x8xf32>
    %cst_103 = arith.constant dense<0.000000e+00> : vector<8xf32>
    %236 = vector.multi_reduction <add>, %235, %cst_103 [1] : vector<8x8xf32> to vector<8xf32>
    %237 = vector.shape_cast %236 : vector<8xf32> to vector<8x1xf32>
    %238 = tpu.reciprocal %237 : vector<8x1xf32> -> vector<8x1xf32>
    %239 = vector.broadcast %238 : vector<8x1xf32> to vector<8x8xf32>
    %240 = arith.mulf %235, %239 : vector<8x8xf32>
    %c0_104 = arith.constant 0 : index
    %c6 = arith.constant 6 : index
    %c0_105 = arith.constant 0 : index
    %c0_106 = arith.constant 0 : index
    %241 = vector.load %arg9[%c0_104, %c6, %c0_105, %c0_106] : memref<1x8x8x8xf32, #tpu.memory_space<vmem>>, vector<1x1x8x8xf32>
    %242 = vector.shape_cast %241 : vector<1x1x8x8xf32> to vector<8x8xf32>
    %243 = vector.shape_cast %240 : vector<8x8xf32> to vector<1x1x8x8xf32>
    tpu.vector_store %arg9[%c0_104, %c6, %c0_105, %c0_106], %243 {strides = array<i32>} : memref<1x8x8x8xf32, #tpu.memory_space<vmem>>, vector<1x1x8x8xf32>,
    %cst_107 = arith.constant dense<0.000000e+00> : vector<8x8xf32>
    %244 = tpu.matmul %240, %227, %cst_107 {dimension_numbers = #tpu.dot_dimension_numbers<[1], [0], [0], [1], [0, 0, 1, 1], [], []>} : vector<8x8xf32>, vector<8x8xf32>, vector<8x8xf32> -> vector<8x8xf32>
    %245 = vector.extract_strided_slice %176 {offsets = [16, 0], sizes = [8, 32], strides = [1, 1]} : vector<32x32xf32> to vector<8x32xf32>
    %cst_108 = arith.constant dense<0.000000e+00> : vector<8x32xf32>
    %246 = tpu.matmul %244, %245, %cst_108 {dimension_numbers = #tpu.dot_dimension_numbers<[1], [0], [0], [1], [0, 0, 1, 1], [], []>} : vector<8x8xf32>, vector<8x32xf32>, vector<8x32xf32> -> vector<8x32xf32>
    %247 = arith.addf %224, %246 : vector<8x32xf32>
    %248 = vector.extract_strided_slice %165 {offsets = [0, 24], sizes = [8, 8], strides = [1, 1]} : vector<8x32xf32> to vector<8x8xf32>
    %249 = vector.extract_strided_slice %170 {offsets = [0, 24], sizes = [8, 8], strides = [1, 1]} : vector<8x32xf32> to vector<8x8xf32>
    %250 = vector.extract_strided_slice %171 {offsets = [0, 24], sizes = [8, 8], strides = [1, 1]} : vector<8x32xf32> to vector<8x8xf32>
    %cst_109 = arith.constant dense<0.000000e+00> : vector<8x8xf32>
    %251 = tpu.matmul %248, %249, %cst_109 {dimension_numbers = #tpu.dot_dimension_numbers<[1], [1], [0], [0], [0, 0, 1, 0], [], []>} : vector<8x8xf32>, vector<8x8xf32>, vector<8x8xf32> -> vector<8x8xf32>
    %cst_110 = arith.constant -1.000000e+10 : f32
    %252 = vector.broadcast %cst_110 : f32 to vector<8x8xf32>
    %253 = arith.select %175, %252, %251 : vector<8x8xi1>, vector<8x8xf32>
    %cst_111 = arith.constant dense<0xFF800000> : vector<8xf32>
    %254 = vector.multi_reduction <maximumf>, %253, %cst_111 [1] : vector<8x8xf32> to vector<8xf32>
    %255 = vector.shape_cast %254 : vector<8xf32> to vector<8x1xf32>
    %256 = vector.broadcast %255 : vector<8x1xf32> to vector<8x8xf32>
    %257 = arith.subf %253, %256 : vector<8x8xf32>
    %258 = math.exp %257 : vector<8x8xf32>
    %cst_112 = arith.constant dense<0.000000e+00> : vector<8xf32>
    %259 = vector.multi_reduction <add>, %258, %cst_112 [1] : vector<8x8xf32> to vector<8xf32>
    %260 = vector.shape_cast %259 : vector<8xf32> to vector<8x1xf32>
    %261 = tpu.reciprocal %260 : vector<8x1xf32> -> vector<8x1xf32>
    %262 = vector.broadcast %261 : vector<8x1xf32> to vector<8x8xf32>
    %263 = arith.mulf %258, %262 : vector<8x8xf32>
    %c0_113 = arith.constant 0 : index
    %c7 = arith.constant 7 : index
    %c0_114 = arith.constant 0 : index
    %c0_115 = arith.constant 0 : index
    %264 = vector.load %arg9[%c0_113, %c7, %c0_114, %c0_115] : memref<1x8x8x8xf32, #tpu.memory_space<vmem>>, vector<1x1x8x8xf32>
    %265 = vector.shape_cast %264 : vector<1x1x8x8xf32> to vector<8x8xf32>
    %266 = vector.shape_cast %263 : vector<8x8xf32> to vector<1x1x8x8xf32>
    tpu.vector_store %arg9[%c0_113, %c7, %c0_114, %c0_115], %266 {strides = array<i32>} : memref<1x8x8x8xf32, #tpu.memory_space<vmem>>, vector<1x1x8x8xf32>,
    %cst_116 = arith.constant dense<0.000000e+00> : vector<8x8xf32>
    %267 = tpu.matmul %263, %250, %cst_116 {dimension_numbers = #tpu.dot_dimension_numbers<[1], [0], [0], [1], [0, 0, 1, 1], [], []>} : vector<8x8xf32>, vector<8x8xf32>, vector<8x8xf32> -> vector<8x8xf32>
    %268 = vector.extract_strided_slice %176 {offsets = [24, 0], sizes = [8, 32], strides = [1, 1]} : vector<32x32xf32> to vector<8x32xf32>
    %cst_117 = arith.constant dense<0.000000e+00> : vector<8x32xf32>
    %269 = tpu.matmul %267, %268, %cst_117 {dimension_numbers = #tpu.dot_dimension_numbers<[1], [0], [0], [1], [0, 0, 1, 1], [], []>} : vector<8x8xf32>, vector<8x32xf32>, vector<8x32xf32> -> vector<8x32xf32>
    %270 = arith.addf %247, %269 : vector<8x32xf32>
    %271 = vector.broadcast %177 : vector<1x32xf32> to vector<8x32xf32>
    %272 = arith.addf %270, %271 : vector<8x32xf32>
    %273 = arith.addf %138, %272 : vector<8x32xf32>
    %274 = arith.mulf %273, %273 : vector<8x32xf32>
    %cst_118 = arith.constant dense<0.000000e+00> : vector<8xf32>
    %275 = vector.multi_reduction <add>, %274, %cst_118 [1] : vector<8x32xf32> to vector<8xf32>
    %276 = vector.shape_cast %275 : vector<8xf32> to vector<8x1xf32>
    %cst_119 = arith.constant 3.200000e+01 : f32
    %277 = vector.broadcast %cst_119 : f32 to vector<8x1xf32>
    %278 = arith.divf %276, %277 : vector<8x1xf32>
    %cst_120 = arith.constant 9.99999997E-7 : f32
    %279 = vector.broadcast %cst_120 : f32 to vector<8x1xf32>
    %280 = arith.addf %278, %279 : vector<8x1xf32>
    %281 = math.rsqrt %280 : vector<8x1xf32>
    %282 = vector.broadcast %281 : vector<8x1xf32> to vector<8x32xf32>
    %283 = arith.mulf %273, %282 : vector<8x32xf32>
    %284 = vector.broadcast %6 : vector<1x32xf32> to vector<8x32xf32>
    %285 = arith.mulf %283, %284 : vector<8x32xf32>
    %c0_121 = arith.constant 0 : index
    %c384 = arith.constant 384 : index
    %286 = vector.load %arg6[%c0_121, %c384] : memref<64x512xf32, #tpu.memory_space<vmem>>, vector<32x64xf32>
    %cst_122 = arith.constant dense<0.000000e+00> : vector<8x64xf32>
    %287 = tpu.matmul %285, %286, %cst_122 {dimension_numbers = #tpu.dot_dimension_numbers<[1], [0], [0], [1], [0, 0, 1, 1], [], []>} : vector<8x32xf32>, vector<32x64xf32>, vector<8x64xf32> -> vector<8x64xf32>
    %c0_123 = arith.constant 0 : index
    %c384_124 = arith.constant 384 : index
    %288 = vector.load %arg7[%c0_123, %c384_124] : memref<1x512xf32, #tpu.memory_space<vmem>>, vector<1x64xf32>
    %289 = vector.broadcast %288 : vector<1x64xf32> to vector<8x64xf32>
    %290 = arith.addf %287, %289 : vector<8x64xf32>
    %cst_125 = arith.constant 0.000000e+00 : f32
    %291 = vector.broadcast %cst_125 : f32 to vector<8x64xf32>
    %292 = arith.maximumf %290, %291 : vector<8x64xf32>
    %c0_126 = arith.constant 0 : index
    %c448 = arith.constant 448 : index
    %293 = vector.load %arg6[%c0_126, %c448] : memref<64x512xf32, #tpu.memory_space<vmem>>, vector<64x32xf32>
    %cst_127 = arith.constant dense<0.000000e+00> : vector<8x32xf32>
    %294 = tpu.matmul %292, %293, %cst_127 {dimension_numbers = #tpu.dot_dimension_numbers<[1], [0], [0], [1], [0, 0, 1, 1], [], []>} : vector<8x64xf32>, vector<64x32xf32>, vector<8x32xf32> -> vector<8x32xf32>
    %c0_128 = arith.constant 0 : index
    %c448_129 = arith.constant 448 : index
    %295 = vector.load %arg7[%c0_128, %c448_129] : memref<1x512xf32, #tpu.memory_space<vmem>>, vector<1x32xf32>
    %296 = vector.broadcast %295 : vector<1x32xf32> to vector<8x32xf32>
    %297 = arith.addf %294, %296 : vector<8x32xf32>
    %298 = arith.addf %273, %297 : vector<8x32xf32>
    %c0_130 = arith.constant 0 : index
    %c0_131 = arith.constant 0 : index
    %c0_132 = arith.constant 0 : index
    %299 = vector.load %arg8[%c0_130, %c0_131, %c0_132] : memref<1x8x32xf32, #tpu.memory_space<vmem>>, vector<1x8x32xf32>
    %300 = vector.shape_cast %299 : vector<1x8x32xf32> to vector<8x32xf32>
    %301 = vector.shape_cast %298 : vector<8x32xf32> to vector<1x8x32xf32>
    tpu.vector_store %arg8[%c0_130, %c0_131, %c0_132], %301 {strides = array<i32>} : memref<1x8x32xf32, #tpu.memory_space<vmem>>, vector<1x8x32xf32>,
    return
  }
  func.func @transform_0(%arg0: i32) -> (i32, i32, i32) {
    %c0_i32 = arith.constant 0 : i32
    %c0_i32_0 = arith.constant 0 : i32
    %c0_i32_1 = arith.constant 0 : i32
    return %arg0, %c0_i32, %c0_i32_0 : i32, i32, i32
  }
  func.func @transform_1(%arg0: i32) -> (i32, i32, i32) {
    %c0_i32 = arith.constant 0 : i32
    %c0_i32_0 = arith.constant 0 : i32
    %c0_i32_1 = arith.constant 0 : i32
    return %arg0, %c0_i32, %c0_i32_0 : i32, i32, i32
  }
  func.func @transform_2(%arg0: i32) -> (i32, i32, i32, i32) {
    %c0_i32 = arith.constant 0 : i32
    %c0_i32_0 = arith.constant 0 : i32
    %c0_i32_1 = arith.constant 0 : i32
    %c0_i32_2 = arith.constant 0 : i32
    return %arg0, %c0_i32, %c0_i32_0, %c0_i32_1 : i32, i32, i32, i32
  }
  func.func @transform_3(%arg0: i32) -> (i32, i32, i32, i32) {
    %c0_i32 = arith.constant 0 : i32
    %c0_i32_0 = arith.constant 0 : i32
    %c0_i32_1 = arith.constant 0 : i32
    %c0_i32_2 = arith.constant 0 : i32
    return %arg0, %c0_i32, %c0_i32_0, %c0_i32_1 : i32, i32, i32, i32
  }
  func.func @transform_4(%arg0: i32) -> (i32, i32) {
    %c0_i32 = arith.constant 0 : i32
    %c0_i32_0 = arith.constant 0 : i32
    %c0_i32_1 = arith.constant 0 : i32
    return %c0_i32, %c0_i32_0 : i32, i32
  }
  func.func @transform_5(%arg0: i32) -> (i32, i32) {
    %c0_i32 = arith.constant 0 : i32
    %c0_i32_0 = arith.constant 0 : i32
    %c0_i32_1 = arith.constant 0 : i32
    return %c0_i32, %c0_i32_0 : i32, i32
  }
  func.func @transform_6(%arg0: i32) -> (i32, i32) {
    %c0_i32 = arith.constant 0 : i32
    %c0_i32_0 = arith.constant 0 : i32
    %c0_i32_1 = arith.constant 0 : i32
    return %c0_i32, %c0_i32_0 : i32, i32
  }
  func.func @transform_7(%arg0: i32) -> (i32, i32, i32) {
    %c0_i32 = arith.constant 0 : i32
    %c0_i32_0 = arith.constant 0 : i32
    %c0_i32_1 = arith.constant 0 : i32
    return %arg0, %c0_i32, %c0_i32_0 : i32, i32, i32
  }
  func.func @transform_8(%arg0: i32) -> (i32, i32, i32, i32) {
    %c0_i32 = arith.constant 0 : i32
    %c0_i32_0 = arith.constant 0 : i32
    %c0_i32_1 = arith.constant 0 : i32
    %c0_i32_2 = arith.constant 0 : i32
    return %arg0, %c0_i32, %c0_i32_0, %c0_i32_1 : i32, i32, i32, i32
  }
}

</mosaic_0001>

<bundles_post_ra>
// kernel: decoder_layer_forward.1
= control target key start
LH: loop header
LB: loop body
LE: loop exit
PB: predicated region body
PF: predicated region fallthrough
CT: control target
= control target key end

     0   :  { %s4754_s0 = inlined_call_operand.hbm [shape: f32[2,8,32], index: 0, kind: input, shape index: {}]   ;;  %s4755_s1 = inlined_call_operand.hbm [shape: f32[2,8,32], index: 1, kind: input, shape index: {}]   ;;  %s4756_s2 = inlined_call_operand.vmem [shape: f32[2,1,8,8], index: 2, kind: input, shape index: {}]   ;;  %s4757_s3 = inlined_call_operand.hbm [shape: f32[2,1,8,8], index: 3, kind: input, shape index: {}]   ;;  %s4758_s4 = inlined_call_operand.hbm [shape: f32[8,64], index: 4, kind: input, shape index: {}]   ;;  %s4759_s5 = inlined_call_operand.hbm [shape: f32[64,512], index: 5, kind: input, shape index: {}]   ;;  %s4760_s6 = inlined_call_operand.hbm [shape: f32[1,512], index: 6, kind: input, shape index: {}]   ;;  %s4761_s7 = inlined_call_operand.hbm [shape: f32[2,8,32], index: 7, kind: output, shape index: {0}]   ;;  %s4762_s8 = inlined_call_operand.vmem [shape: f32[2,8,8,8], index: 8, kind: output, shape index: {1}]  }
   0x1   :  { %4784 = sst [smem:[#allocation25_spill]] %s4755_s1 }
   0x2   :  { %4785 = sst [smem:[#allocation26_spill]] %s4756_s2 }
   0x3   :  { %4786 = sst [smem:[#allocation27_spill]] %s4758_s4 }
   0x4   :  { %4787 = sst [smem:[#allocation28_spill]] %s4761_s7 }
   0x5   :  { %4788 = sst [smem:[#allocation29_spill]] %s4762_s8 }
   0x6   :  { %14 = vsyncpa [#allocation3], 0 }
   0x7   :  { %16 = vsyncpa [#allocation3 + $0x1], 0 }
   0x8   :  { %17 = vsyncpa [#allocation6], 0 }
   0x9   :  { %19 = vsyncpa [#allocation6 + $0x1], 0 }
   0xa   :  { %20 = vsyncpa [#allocation9], 0 }
   0xb   :  { %21 = vsyncpa [#allocation12], 0 }
   0xc   :  { %22 = vsyncpa [#allocation4], 0 }
   0xd   :  { %24 = vsyncpa [#allocation4 + $0x1], 0  ;;  %s4068_s27 = smov 0   ;;  %s4070_s28 = smov 0  }
   0xe   :  { %s4072_s29 = smov 0   ;;  %s4074_s30 = smov 0  }
   0xf LB: > { %4789 = sst [smem:[#allocation19_spill]] %s3982_s27  ;;  %s4089_s9 = sadd.s32 4294967295, %s3994_s30   ;;  %s3994_s30 = sphi %s4074_s30, %s4832_s30   ;;  %s3990_s29 = sphi %s4072_s29, %s4836_s29   ;;  %s3986_s28 = sphi %s4070_s28, %s4835_s28   ;;  %s3982_s27 = sphi %s4068_s27, %s4834_s27  }
  0x10   : > { %4790 = sst [smem:[#allocation20_spill]] %s3994_s30  ;;  %s3208_s10 = sadd.s32 4294967294, %s3994_s30  }
  0x11   : > { %p50_p0 = scmp.ne.s32.totalorder %s3986_s28, %s3982_s27  ;;  %p4763_p1 = scmp.eq.s32.totalorder %s4089_s9, 0 }
  0x12   : > { %p221_p3 = scmp.eq.s32.totalorder %s3208_s10, 1  ;;  %p3209_p5 = scmp.ge.s32.totalorder %s3994_s30, 1 }
  0x13   : > { %p4098_p4 = por %p4763_p1, %p50_p0  ;;  %p254_p7 = scmp.lt.s32.totalorder %s3994_s30, 3 }
  0x14   : > { %p4103_p6 = por %p221_p3, %p50_p0  ;;  %s3996_s14 = smov [#allocation8]  }
  0x15   : > { %s4791_s11 = scalar_select %p4098_p4, 1, 0 }
  0x16   : > { %s4792_s12 = scalar_select %p4103_p6, 1, 0 }
  0x17   : > { %p4108_p8 = pnand %p3209_p5, %p254_p7  ;;  %s267_s15 = sshll.u32 %s3996_s14, 4  ;;  %s268_s15 = int_to_ptr.vmem [resolvable:$true] %s267_s15 }
  0x18   : > { %4793 = sst [smem:[#allocation21_spill]] %s4792_s12  ;;  %s4116_s16 = sadd.s32 1, %s3994_s30  }
  0x19   : > { %s4794_s13 = scalar_select %p4108_p8, 1, 0 }
  0x1a   : > { %p3587_p10 = pneg %p4108_p8  ;;  %4795 = sst [smem:[#allocation22_spill]] %s4116_s16 }
  0x1b   : > { %s34_s18 = ssub.s32 %s3994_s30, %s4116_s16  ;;  %s37_s20 = sadd.s32 1, %s3990_s29 }
  0x1c   : > { %p4120_p11 = pnand %p3587_p10, %p4763_p1  ;;  %p4126_p12 = scmp.eq.s32.totalorder %s34_s18, 0 }
  0x1d   : > { %s4798_s4 = sld [smem:[#allocation27_spill]] }
  0x1e   : > { %s4796_s17 = scalar_select %p4120_p11, 1, 0 }
  0x1f   : > { %s4797_s19 = scalar_select %p4126_p12, 1, 0 }
  0x20   : > { %p4141_p3 = pneg %p4120_p11 }
  0x22   : > { %s4799_s26 = scalar_select %p4141_p3, 1, 0 }
  0x23   : > { %s3742_s23 = scalar_lea.hbm %s4798_s4, 128 }
  0x24   : > { %p3743_p0 = scmp.ne.s32.totalorder %s4798_s4, %s3742_s23  ;;  %p3749_p10 = scmp.lt.u32.totalorder %s3742_s23, %s4798_s4 }
  0x26   : > { %p3745_p5 = pnand %p4141_p3, %p3743_p0 }
  0x28   : > { %p3746_p7 = pneg %p3745_p5 }
  0x2a   : > { %p3751_p9 = pnand %p3749_p10, %p3746_p7 }
  0x2c   : > { %3754 = shalt.err (!%p3751_p9)
}
  0x2d   : > { %s3755_s18 = scalar_lea.vmem %s268_s15, 128  ;;  %p3763_p6 = scmp.lt.s32.totalorder %s268_s15, %s268_s15 }
  0x2e   : > { %p3756_p1 = scmp.ne.s32.totalorder %s268_s15, %s3755_s18  ;;  %p3764_p4 = scmp.lt.s32.totalorder %s3755_s18, %s3755_s18 }
  0x30   : > { %p3758_p2 = pnand %p3756_p1, %p4141_p3  ;;  %p3765_p8 = por %p3764_p4, %p3763_p6 }
  0x32   : > { %p3759_p13 = pneg %p3758_p2 }
  0x34   : > { %p3766_p12 = pnand %p3765_p8, %p3759_p13 }
  0x36   : > { %3769 = shalt.err (!%p3766_p12)
}
  0x37   : > { %3590 = dma.hbm_to_vmem [thread:$0]  (!%p4120_p11), %s4798_s4, 128, %s268_s15, [#allocation9]  }
  0x38   : > { %p4800_p1 = scmp.ne.s32.totalorder %s4797_s19, 0  ;;  %p45_p2 = scmp.eq.s32.totalorder %s3994_s30, 0 }
  0x39   : > { %p4802_p4 = scmp.ne.s32.totalorder %s3990_s29, %s3986_s28  ;;  %p4803_p6 = scmp.eq.s32.totalorder %s4089_s9, 1 }
  0x3a   : > { %s4160_s23 = scalar_select %p4800_p1, %s3990_s29, %s37_s20  }
  0x3b   : > { %p4168_p8 = por %p4803_p6, %p4802_p4  ;;  %p3614_p9 = scmp.lt.s32.totalorder %s3994_s30, 2 }
  0x3c   : > { %4801 = sst [smem:[#allocation23_spill]] %s4160_s23  ;;  %s4766_s25 = sand.u32 1, %s3990_s29  }
  0x3d   : > { %s4804_s24 = scalar_select %p4168_p8, 1, 0 }
  0x3e   : > { %p4806_p12 = pmov %p4802_p4  ;;  %s4179_s10 = sshll.u32 %s4766_s25, 3 }
  0x3f   : > { %4805 = sst [smem:[#allocation24_spill]] %s4804_s24  ;;  %s4182_s14 = sshll.u32 %s3994_s30, 7 }
  0x40   : > { %p46_p13 = por %p45_p2, %p4806_p12  ;;  %s320_s15 = sand.u32 1, %s3994_s30  }
  0x41   : > { %s4808_s1 = sld [smem:[#allocation25_spill]]  ;;  %s324_s22 = scalar_lea.vmem [#allocation5], %s4179_s10 }
  0x42   : > { %p4185_p0 = pnand %p3614_p9, %p46_p13  ;;  %s331_s25 = sshll.u32 %s324_s22, 4  ;;  %s4196_s25 = int_to_ptr.vmem [resolvable:$true] %s331_s25 }
  0x43   : > { %s4198_s4 = scalar_lea.sflag [#allocation6], %s320_s15 }
  0x44   : > { %s4807_s19 = scalar_select %p4185_p0, 1, 0 }
  0x45   : > { %p4204_p7 = pneg %p4185_p0 }
  0x47   : > { %s4193_s21 = scalar_lea.hbm %s4808_s1, %s4182_s14  ;;  %s3775_s30 = scalar_lea.hbm %s4808_s1, 256 }
  0x48   : > { %s3770_s23 = scalar_lea.hbm %s4193_s21, 128  ;;  %p3776_p2 = scmp.lt.u32.totalorder %s4193_s21, %s4808_s1 }
  0x49   : > { %p3771_p5 = scmp.ne.s32.totalorder %s4193_s21, %s3770_s23  ;;  %p3777_p4 = scmp.lt.u32.totalorder %s3775_s30, %s3770_s23 }
  0x4a   : > { %s4809_s16 = scalar_select %p4204_p7, 1, 0 }
  0x4b   : > { %p3773_p10 = pnand %p4204_p7, %p3771_p5  ;;  %p3778_p6 = por %p3777_p4, %p3776_p2 }
  0x4c   : > { %p3779_p9 = scmp.lt.u32.totalorder %s3770_s23, %s4193_s21 }
  0x4d   : > { %p3774_p1 = pneg %p3773_p10 }
  0x4e   : > { %p3780_p12 = por %p3779_p9, %p3778_p6 }
  0x50   : > { %p3781_p13 = pnand %p3780_p12, %p3774_p1 }
  0x52   : > { %3784 = shalt.err (!%p3781_p13)
}
  0x53   : > { %s3785_s15 = scalar_lea.vmem %s4196_s25, 128  ;;  %s3997_s20 = smov [#allocation5]  }
  0x54   : > { %p3786_p5 = scmp.ne.s32.totalorder %s4196_s25, %s3785_s15  ;;  %s3790_s18 = sshll.u32 %s3997_s20, 4  ;;  %s3791_s18 = int_to_ptr.vmem [resolvable:$false] %s3790_s18 }
  0x55   : > { %s3792_s12 = scalar_lea.vmem %s3791_s18, 256  ;;  %p3793_p11 = scmp.lt.s32.totalorder %s4196_s25, %s3791_s18 }
  0x56   : > { %p3788_p10 = pnand %p3786_p5, %p4204_p7  ;;  %p3794_p3 = scmp.lt.s32.totalorder %s3792_s12, %s3785_s15 }
  0x58   : > { %p3789_p8 = pneg %p3788_p10  ;;  %p3795_p2 = por %p3794_p3, %p3793_p11 }
  0x5a   : > { %p3796_p4 = pnand %p3795_p2, %p3789_p8 }
  0x5c   : > { %3799 = shalt.err (!%p3796_p4)
}
  0x5d   : > { %3603 = dma.hbm_to_vmem [thread:$0]  (!%p4185_p0), %s4193_s21, 128, %s4196_s25, %s4198_s4  }
  0x5e   : > { %s3998_s30 = smov [#allocation10]   ;;  %s3800_s20 = scalar_lea.hbm %s4759_s5, 4096 }
  0x5f   : > { %s277_s23 = sshll.u32 %s3998_s30, 4  ;;  %p3801_p11 = scmp.ne.s32.totalorder %s4759_s5, %s3800_s20  ;;  %s278_s23 = int_to_ptr.vmem [resolvable:$true] %s277_s23 }
  0x60   : > { %p4810_p3 = scmp.ne.s32.totalorder %s4799_s26, 0  ;;  %p3807_p6 = scmp.lt.u32.totalorder %s3800_s20, %s4759_s5 }
  0x62   : > { %p3803_p8 = pnand %p3801_p11, %p4810_p3 }
  0x64   : > { %p3804_p1 = pneg %p3803_p8 }
  0x66   : > { %p3809_p9 = pnand %p3807_p6, %p3804_p1 }
  0x68   : > { %3812 = shalt.err (!%p3809_p9)
}
  0x69   : > { %s3813_s25 = scalar_lea.vmem %s278_s23, 4096  ;;  %p3821_p10 = scmp.lt.s32.totalorder %s278_s23, %s278_s23 }
  0x6a   : > { %p3814_p12 = scmp.ne.s32.totalorder %s278_s23, %s3813_s25  ;;  %p3822_p2 = scmp.lt.s32.totalorder %s3813_s25, %s3813_s25 }
  0x6c   : > { %p3816_p13 = pnand %p3814_p12, %p4810_p3  ;;  %p3823_p4 = por %p3822_p2, %p3821_p10 }
  0x6e   : > { %p3817_p5 = pneg %p3816_p13 }
  0x70   : > { %p3824_p0 = pnand %p3823_p4, %p3817_p5 }
  0x72   : > { %3827 = shalt.err (!%p3824_p0)
}
  0x73   : > { %s3999_s1 = smov 512   ;;  %s4000_s27 = smov 32  }
  0x74   : > { %p4811_p11 = scmp.ne.s32.totalorder %s4796_s17, 0  ;;  %s4001_s22 = smov [#allocation11]  }
  0x75   : > { %s291_s20 = sshll.u32 %s4001_s22, 4  ;;  %s4250_s12 = scalar_lea.hbm %s4754_s0, %s4182_s14  ;;  %s292_s20 = int_to_ptr.vmem [resolvable:$true] %s291_s20 }
  0x76   : > { %3593 = dma.hbm_to_vmem [thread:$0]  (!%p4811_p11), %s4759_s5, 4096, %s278_s23, [#allocation9], %s3999_s1, %s3999_s1, %s4000_s27  }
  0x77   : > { %s3828_s24 = scalar_lea.hbm %s4760_s6, 64 }
  0x78   : > { %p3829_p0 = scmp.ne.s32.totalorder %s4760_s6, %s3828_s24  ;;  %p3835_p6 = scmp.lt.u32.totalorder %s3828_s24, %s4760_s6 }
  0x7a   : > { %p3831_p8 = pnand %p3829_p0, %p4810_p3 }
  0x7c   : > { %p3832_p1 = pneg %p3831_p8 }
  0x7e   : > { %p3837_p9 = pnand %p3835_p6, %p3832_p1 }
  0x80   : > { %3840 = shalt.err (!%p3837_p9)
}
  0x81   : > { %s3841_s27 = scalar_lea.vmem %s292_s20, 64  ;;  %p3849_p10 = scmp.lt.s32.totalorder %s292_s20, %s292_s20 }
  0x82   : > { %p3842_p12 = scmp.ne.s32.totalorder %s292_s20, %s3841_s27  ;;  %p3850_p2 = scmp.lt.s32.totalorder %s3841_s27, %s3841_s27 }
  0x84   : > { %p3844_p13 = pnand %p3842_p12, %p4810_p3  ;;  %p3851_p4 = por %p3850_p2, %p3849_p10 }
  0x86   : > { %p3845_p5 = pneg %p3844_p13 }
  0x88   : > { %p3852_p7 = pnand %p3851_p4, %p3845_p5 }
  0x8a   : > { %3855 = shalt.err (!%p3852_p7)
}
  0x8b   : > { %3596 = dma.hbm_to_vmem [thread:$0]  (!%p4811_p11), %s4760_s6, 64, %s292_s20, [#allocation12]  }
  0x8c   : > { %s306_s8 = scalar_lea.vmem [#allocation2], %s4179_s10  ;;  %s4277_s17 = scalar_lea.hbm %s4757_s3, %s4182_s14 }
  0x8d   : > { %s313_s26 = sshll.u32 %s306_s8, 4  ;;  %s4812_s30 = sand.u32 1, %s3990_s29   ;;  %s4271_s26 = int_to_ptr.vmem [resolvable:$true] %s313_s26 }
  0x8e   : > { %s303_s22 = scalar_lea.sflag [#allocation3], %s4812_s30  ;;  %s3856_s18 = scalar_lea.hbm %s4250_s12, 128 }
  0x8f   : > { %p3857_p7 = scmp.ne.s32.totalorder %s4250_s12, %s3856_s18  ;;  %p4813_p3 = scmp.ne.s32.totalorder %s4809_s16, 0 }
  0x90   : > { %s3861_s20 = scalar_lea.hbm %s4754_s0, 256  ;;  %p3862_p11 = scmp.lt.u32.totalorder %s4250_s12, %s4754_s0 }
  0x91   : > { %p3859_p0 = pnand %p3857_p7, %p4813_p3  ;;  %p3863_p1 = scmp.lt.u32.totalorder %s3861_s20, %s3856_s18 }
  0x92   : > { %p3865_p9 = scmp.lt.u32.totalorder %s3856_s18, %s4250_s12 }
  0x93   : > { %p3860_p8 = pneg %p3859_p0  ;;  %p3864_p6 = por %p3863_p1, %p3862_p11 }
  0x95   : > { %p3866_p12 = por %p3865_p9, %p3864_p6 }
  0x97   : > { %p3867_p13 = pnand %p3866_p12, %p3860_p8 }
  0x99   : > { %3870 = shalt.err (!%p3867_p13)
}
  0x9a   : > { %s3871_s14 = scalar_lea.vmem %s4271_s26, 128  ;;  %s4002_s27 = smov [#allocation2]  }
  0x9b   : > { %p3872_p5 = scmp.ne.s32.totalorder %s4271_s26, %s3871_s14  ;;  %s3876_s2 = sshll.u32 %s4002_s27, 4  ;;  %s3877_s2 = int_to_ptr.vmem [resolvable:$false] %s3876_s2 }
  0x9c   : > { %s3878_s7 = scalar_lea.vmem %s3877_s2, 256  ;;  %p3879_p4 = scmp.lt.s32.totalorder %s4271_s26, %s3877_s2 }
  0x9d   : > { %p3874_p10 = pnand %p3872_p5, %p4813_p3  ;;  %p3880_p7 = scmp.lt.s32.totalorder %s3878_s7, %s3871_s14 }
  0x9f   : > { %p3875_p2 = pneg %p3874_p10  ;;  %p3881_p0 = por %p3880_p7, %p3879_p4 }
  0xa1   : > { %p3882_p11 = pnand %p3881_p0, %p3875_p2 }
  0xa3   : > { %3885 = shalt.err (!%p3882_p11)
}
  0xa4   : > { %p4814_p8 = scmp.ne.s32.totalorder %s4807_s19, 0  ;;  %s349_s8 = scalar_lea.vmem [#allocation7], %s4179_s10 }
  0xa5   : > { %s356_s24 = sshll.u32 %s349_s8, 4  ;;  %s3886_s21 = scalar_lea.hbm %s4277_s17, 128  ;;  %s357_s24 = int_to_ptr.vmem [resolvable:$true] %s356_s24 }
  0xa6   : > { %3600 = dma.hbm_to_vmem [thread:$0]  (!%p4814_p8), %s4250_s12, 128, %s4271_s26, %s303_s22  }
  0xa7   : > { %p3887_p1 = scmp.ne.s32.totalorder %s4277_s17, %s3886_s21  ;;  %s3891_s15 = scalar_lea.hbm %s4757_s3, 256 }
  0xa8   : > { %p3892_p12 = scmp.lt.u32.totalorder %s4277_s17, %s4757_s3  ;;  %p3893_p13 = scmp.lt.u32.totalorder %s3891_s15, %s3886_s21 }
  0xa9   : > { %p3889_p6 = pnand %p3887_p1, %p4813_p3  ;;  %p3895_p10 = scmp.lt.u32.totalorder %s3886_s21, %s4277_s17 }
  0xaa   : > { %p3894_p5 = por %p3893_p13, %p3892_p12 }
  0xab   : > { %p3890_p9 = pneg %p3889_p6 }
  0xac   : > { %p3896_p2 = por %p3895_p10, %p3894_p5 }
  0xae   : > { %p3897_p4 = pnand %p3896_p2, %p3890_p9 }
  0xb0   : > { %3900 = shalt.err (!%p3897_p4)
}
  0xb1   : > { %s3901_s10 = scalar_lea.vmem %s357_s24, 128  ;;  %s4003_s12 = smov [#allocation7]  }
  0xb2   : > { %p3902_p7 = scmp.ne.s32.totalorder %s357_s24, %s3901_s10  ;;  %s3906_s26 = sshll.u32 %s4003_s12, 4  ;;  %s3907_s26 = int_to_ptr.vmem [resolvable:$false] %s3906_s26 }
  0xb3   : > { %s3908_s22 = scalar_lea.vmem %s3907_s26, 256  ;;  %p3909_p1 = scmp.lt.s32.totalorder %s357_s24, %s3907_s26 }
  0xb4   : > { %p3904_p0 = pnand %p3902_p7, %p4813_p3  ;;  %p3910_p6 = scmp.lt.s32.totalorder %s3908_s22, %s3901_s10 }
  0xb6   : > { %p3905_p11 = pneg %p3904_p0  ;;  %p3911_p8 = por %p3910_p6, %p3909_p1 }
  0xb8   : > { %p3912_p12 = pnand %p3911_p8, %p3905_p11 }
  0xba   : > { %3915 = shalt.err (!%p3912_p12)
}
  0xbb   : > { %p4815_p13 = scmp.ne.s32.totalorder %s4807_s19, 0  ;;  %p4816_p9 = scmp.ne.s32.totalorder %s4794_s13, 0 }
  0xbc   : > { %s4324_s16 = sand.u32 (!%p4816_p9), 1, %s3986_s28   ;;  %p4817_p3 = scmp.ne.s32.totalorder (!%p4816_p9), %s4791_s11, 0 }
  0xbd   : > { %3606 = dma.hbm_to_vmem [thread:$0]  (!%p4815_p13), %s4277_s17, 128, %s357_s24, %s4198_s4  }
  0xbe   : > { %365 = sbr.rel (%p4816_p9) target bundleno = 6514 (0x1972), region = 48  ;;  %s4327_s23 = sshll.u32 (!%p4816_p9), %s4324_s16, 3 }
  0xbf   : > { %s368_s1 = scalar_lea.sflag (!%p4816_p9), [#allocation3], %s4324_s16  ;;  %s371_s14 = scalar_lea.vmem (!%p4816_p9), [#allocation2], %s4327_s23 }
  0xc5   : > { %3961 = dma.done.wait (%p4817_p3), %s368_s1, 128  }
  0xc6   : > { %3963 = vsyncadd (%p4817_p3), %s368_s1, 4294967168  ;;  %s376_s4 = sand.u32 1, %s4089_s9   ;;  %s380_s19 = scalar_lea.vmem [#allocation5], %s4327_s23 }
  0xc7   : > { %s377_s13 = scalar_lea.sflag [#allocation6], %s376_s4 }
  0xc8   : > { %3965 = dma.done.wait (%p4817_p3), %s377_s13, 256  }
  0xc9   : > { %3967 = vsyncadd (%p4817_p3), %s377_s13, 4294967040  ;;  %s389_s17 = scalar_lea.vmem [#allocation7], %s4327_s23  ;;  %p4818_p8 = scmp.eq.s32.totalorder %s4089_s9, 0 }
  0xcb   : > { %3969 = dma.done.wait (%p4818_p8), [#allocation9], 4224   ;;  %p4819_p5 = pmov %p4818_p8 }
  0xcd   : > { %3971 = vsyncadd (%p4819_p5), [#allocation9], 4294963072  ;;  %p4820_p10 = pmov %p4819_p5 }
  0xce   : > { %p4821_p2 = pmov %p4819_p5 }
  0xcf   : > { %3973 = dma.done.wait (%p4820_p10), [#allocation12], 64  }
  0xd0   : > { %3975 = vsyncadd (%p4821_p2), [#allocation12], 4294967232  ;;  %v4350_v0 = vld [vmem:[%s371_s14] sm:$0xff]  ;;  %vm467_vm0 = vcmask 261120   ;;  %v3231_v3 = vld [vmem:[#allocation11 + $0x3] ss:$0 sm:$0xff]  ;;  %v495_v25 = vlaneseq }
  0xd1   : > { %v466_v1 = vmul.f32 %v4350_v0, %v4350_v0  ;;  %v4355_v4 = vld [vmem:[#allocation10 + $0x8] sm:$0xff]  ;;  %v485_v6 = vld [vmem:[#allocation10] sm:$0xff]  ;;  %s4004_s11 = smov 32   ;;  %v4005_v16 = vmov 0.0   ;;  %v4370_v17 = vld [vmem:[#allocation8] sm:$0xff]  ;;  %s4006_s27 = smov 96  }
  0xd2   : > { %v4357_v5 = vld [vmem:[#allocation10 + $0x28] sm:$0xff]  ;;  %v487_v8 = vld [vmem:[#allocation10 + $0x20] sm:$0xff]  ;;  %572 = vmatprep.mubr.f32.mxu0 %v4005_v16  ;;  %3362 = vmatprep.subr.mxu1 %v4005_v16  ;;  %s4007_s2 = smov 64   ;;  %v496_v26 = vshrl.u32 %v495_v25, 7  ;;  %vm4008_vm1 = vmmov 0   ;;  %s4009_s7 = smov 56  }
  0xd3   : > { %v468_v2 = vsel %vm467_vm0, %v466_v1, 0.0  ;;  %v3529_v7 = vpack.c.bf16 %v4357_v5, %v4355_v4  ;;  %v4361_v9 = vld [vmem:[#allocation10 + $0x48] sm:$0xff]  ;;  %v3531_v11 = vpack.c.bf16 %v487_v8, %v485_v6  ;;  %v489_v13 = vld [vmem:[#allocation10 + $0x40] sm:$0xff]  ;;  %590 = vrot.lane.b32.xlu1 %v4370_v17, %s4006_s27  ;;  %3364 = vmatprep.mubr.msk.f32.mxu1 %vm4008_vm1, %v4005_v16  ;;  %s4010_s8 = smov 120   ;;  %vm605_vm2 = vcmask 64512   ;;  %p453_p4 = scmp.lt.s32.totalorder %s4089_s9, 1 }
  0xd4   : > { %469 = vadd.xlane.f32.xlu0 %v468_v2  ;;  %v4363_v10 = vld [vmem:[#allocation10 + $0x68] sm:$0xff]  ;;  %v491_v14 = vld [vmem:[#allocation10 + $0x60] sm:$0xff]  ;;  %v501_v27 = vsub.s32 1, %v496_v26  ;;  %v497_v29 = vsub.s32 0, %v496_v26  ;;  %s4822_s15 = sld [smem:[#allocation26_spill]]  ;;  %s4011_s20 = smov 48  }
  0xd5   : > { %v3533_v12 = vpack.c.bf16 %v4363_v10, %v4361_v9  ;;  %3530 = vmatprep.subr.bf16.mxu0 %v3529_v7  ;;  %v3535_v15 = vpack.c.bf16 %v491_v14, %v489_v13  ;;  %v493_v28 = vld [vmem:[#allocation11] sm:$0x3]  ;;  %s4415_s24 = scalar_select %p453_p4, %s4089_s9, 1  ;;  %vm2931_vm5 = vcmask 523264  }
  0xd6   : > { %3532 = vmatpush1.bf16.msra.mxu0 %v3531_v11  ;;  %v502_v30 = vrot.slane %v493_v28, %v501_v27  ;;  %v498_v31 = vrot.slane %v493_v28, %v497_v29  ;;  %s4012_s10 = smov 24   ;;  %s4013_s12 = smov 112  }
  0xd7   : > { %3534 = vmatprep.subr.bf16.mxu0 %v3533_v12  ;;  %586 = vrot.lane.b32.xlu1 %v4370_v17, %s4007_s2  ;;  %s3228_s21 = sshll.u32 %s4415_s24, 3  ;;  %s3284_s26 = sshll.u32 %s4415_s24, 6 }
  0xd8   : > { %s4823_s14 = sld [smem:[#allocation29_spill]]  ;;  %s4014_s13 = smov 16  }
  0xd9   : > { %s4016_s24 = smov 104  }
  0xda   : > { %3536 = vmatpush1.bf16.msra.mxu0 %v3535_v15  ;;  %s456_s25 = scalar_lea.vmem %s4822_s15, %s3228_s21  ;;  %s4017_s21 = smov 8  }
  0xdb   : > { %3357 = vmatprep.subr.mxu0 %v4005_v16  ;;  %v4421_v48 = vld [vmem:[%s456_s25] sm:$0xff]  ;;  %s4825_s25 = sld [smem:[#allocation28_spill]] }
  0xdc   : > { %vm600_vm3 = vcmp.gt.f32.partialorder %v4421_v48, 0.5 }
  0xde   : > { %s4448_s4 = scalar_lea.vmem %s4823_s14, %s3284_s26 }
  0xea   : > { %481 = vrot.lane.b32.xlu0 %v3231_v3, %s4004_s11 }
 0x145   : > { %v591_v35 = vpop.permute.xlu1 %590 }
 0x149   : > { %v587_v39 = vpop.permute.xlu1 %586 }
 0x161   : > { %v470_v18 = vpop.xlane.xlu0 %469 }
 0x162   : > { %v472_v19 = vmul.f32 0.03125, %v470_v18 }
 0x164   : > { %v473_v20 = vadd.f32 1e-06, %v472_v19 }
 0x165   : > { %v4377_v22 = vpop.permute.xlu0 %481 }
 0x166   : > { %3704 = vrsqrt.f32 %v473_v20 }
 0x170   : > { %v3705_v21 = vpop.eup %3704 }
 0x171   : > { %v475_v23 = vmul.f32 %v3705_v21, %v4350_v0 }
 0x173   : > { %v484_v24 = vmul.f32 %v4377_v22, %v475_v23 }
 0x175   : > { %3232 = vmatmul.mubr.msk.f32.vlgmr.msra.gmra.mrb[0].mxu0 %vm467_vm0, %v484_v24 }
 0x176   : > { %3359 = vmatprep.mubr.msk.f32.mxu0 %vm4008_vm1, %v4005_v16 }
 0x248   : > { %v574_v32 = vpop.f32.mrb[0].mxu0 }
 0x249   : > { %v576_v33 = vpop.f32.mrb[1].mxu0  ;;  %v4382_v36 = vadd.f32 %v574_v32, %v498_v31 }
 0x24a   : > { %v577_v34 = vadd.f32 %v576_v33, %v502_v30 }
 0x24b   : > { %v579_v38 = vmul.f32 %v4382_v36, %v4370_v17  ;;  %v589_v40 = vmul.f32 %v587_v39, %v4382_v36 }
 0x24c   : > { %v593_v37 = vmul.f32 %v591_v35, %v577_v34 }
 0x24e   : > { %595 = vrot.lane.b32.xlu1 %v593_v37, %s4007_s2 }
 0x252   : > { %581 = vrot.lane.b32.xlu1 %v579_v38, %s4006_s27 }
 0x2c0   : > { %v596_v41 = vpop.permute.xlu1 %595 }
 0x2c1   : > { %v4393_v42 = vadd.f32 %v596_v41, %v589_v40 }
 0x2c3   : > { %603 = vrot.lane.b32.xlu1 %v4393_v42, %s4007_s2 }
 0x2c4   : > { %v582_v43 = vpop.permute.xlu1 %581 }
 0x2c5   : > { %v4398_v44 = vadd.f32 %v582_v43, %v579_v38 }
 0x2c7   : > { %773 = vrot.lane.b32.xlu1 %v4393_v42, %s4009_s7  ;;  %s4015_s7 = smov 40  }
 0x2cb   : > { %771 = vrot.lane.b32.xlu1 %v4398_v44, %s4010_s8 }
 0x335   : > { %v604_v45 = vpop.permute.xlu1 %603 }
 0x336   : > { %3358 = vmatpush3.xpose.msk.msra.mxu0 %vm605_vm2, %v604_v45 }
 0x337   : > { %3367 = vmatprep.subr.mxu0 %v4005_v16 }
 0x339   : > { %3360 = vmatmul.mubr.msk.f32.vlgmr.msra.gmra.mrb[2].mxu0 %vm605_vm2, %v4398_v44  ;;  %v774_v46 = vpop.permute.xlu1 %773 }
 0x33a   : > { %3368 = vmatpush3.xpose.msk.msra.mxu0 %vm605_vm2, %v774_v46  ;;  %3369 = vmatprep.mubr.msk.f32.mxu0 %vm4008_vm1, %v4005_v16 }
 0x33b   : > { %3377 = vmatprep.subr.mxu0 %v4005_v16 }
 0x33d   : > { %v772_v47 = vpop.permute.xlu1 %771 }
 0x33e   : > { %3370 = vmatmul.mubr.msk.f32.vlgmr.msra.gmra.mrb[4].mxu0 %vm605_vm2, %v772_v47 }
 0x33f   : > { %3379 = vmatprep.mubr.msk.f32.mxu0 %vm4008_vm1, %v4005_v16 }
 0x40c   : > { %v677_v49 = vpop.f32.mrb[2].mxu0 }
 0x40d   : > { %v681_v50 = vsel %vm600_vm3, -1e+10, %v677_v49  ;;  %v3361_v51 = vpop.f32.mrb[3].mxu0 }
 0x40e   : > { %v682_v52 = vsel %vm605_vm2, %v681_v50, -inf }
 0x40f   : > { %683 = vmax.xlane.f32.xlu0 %v682_v52 }
 0x411   : > { %v845_v53 = vpop.f32.mrb[4].mxu0 }
 0x412   : > { %v849_v54 = vsel %vm600_vm3, -1e+10, %v845_v53  ;;  %v3371_v55 = vpop.f32.mrb[5].mxu0 }
 0x413   : > { %v850_v56 = vsel %vm605_vm2, %v849_v54, -inf }
 0x414   : > { %851 = vmax.xlane.f32.xlu1 %v850_v56 }
 0x425   : > { %695 = vrot.lane.b32.xlu1 %v4382_v36, %s4004_s11 }
 0x429   : > { %940 = vrot.lane.b32.xlu1 %v4357_v5, %s4006_s27 }
 0x42d   : > { %1095 = vrot.lane.b32.xlu1 %v4393_v42, %s4011_s20 }
 0x49c   : > { %v684_v57 = vpop.xlane.xlu0 %683 }
 0x49d   : > { %v685_v58 = vsub.f32 %v681_v50, %v684_v57 }
 0x49f   : > { %v686_v59 = vmul.f32 1.442695, %v685_v58 }
 0x4a1   : > { %3706 = vpow2.f32 %v686_v59  ;;  %v852_v60 = vpop.xlane.xlu1 %851 }
 0x4a2   : > { %v853_v61 = vsub.f32 %v849_v54, %v852_v60 }
 0x4a4   : > { %v854_v62 = vmul.f32 1.442695, %v853_v61 }
 0x4a5   : > { %v696_v63 = vpop.permute.xlu1 %695 }
 0x4a6   : > { %3708 = vpow2.f32 %v854_v62  ;;  %3363 = vmatpush3.msra.mxu1 %v696_v63 }
 0x4a7   : > { %3372 = vmatprep.subr.mxu1 %v4005_v16 }
 0x4a9   : > { %v941_v1 = vpop.permute.xlu1 %940 }
 0x4aa   : > { %3378 = vmatpush3.msra.mxu0 %v941_v1  ;;  %v3252_v1 = vld [vmem:[#allocation11 + $0x1] ss:$0 sm:$0xff] }
 0x4ab   : > { %v3707_v2 = vpop.eup %3706  ;;  %3387 = vmatprep.subr.mxu0 %v4005_v16 }
 0x4ac   : > { %v688_v3 = vsel %vm605_vm2, %v3707_v2, 0.0 }
 0x4ad   : > { %689 = vadd.xlane.f32.xlu0 %v688_v3  ;;  %v1096_v25 = vpop.permute.xlu1 %1095 }
 0x4b0   : > { %v3709_v6 = vpop.eup %3708 }
 0x4b1   : > { %v856_v7 = vsel %vm605_vm2, %v3709_v6, 0.0 }
 0x4b2   : > { %857 = vadd.xlane.f32.xlu0 %v856_v7 }
 0x4c8   : > { %863 = vrot.lane.b32.xlu0 %v4382_v36, %s4012_s10  ;;  %s3008_s10 = scalar_lea.sflag [#allocation4], %s4324_s16 }
 0x4cc   : > { %1093 = vrot.lane.b32.xlu0 %v4398_v44, %s4013_s12 }
 0x4d0   : > { %1017 = vrot.lane.b32.xlu0 %v4355_v4, %s4006_s27 }
 0x53a   : > { %v690_v8 = vpop.xlane.xlu0 %689 }
 0x53b   : > { %3710 = vrcp.f32 %v690_v8 }
 0x53f   : > { %v858_v11 = vpop.xlane.xlu0 %857 }
 0x540   : > { %3712 = vrcp.f32 %v858_v11  ;;  %v3674_v11 = vpack.i.bf16 %v4357_v5, %v4355_v4  ;;  %v3679_v4 = vpack.i.bf16 %v4363_v10, %v4361_v9 }
 0x543   : > { %v864_v12 = vpop.permute.xlu0 %863 }
 0x545   : > { %v3711_v13 = vpop.eup %3710 }
 0x546   : > { %v692_v14 = vmul.f32 %v3711_v13, %v3707_v2  ;;  %v4521_v13 = vld [vmem:[#allocation10 + $0x30] sm:$0xff] }
 0x547   : > { %v1094_v15 = vpop.permute.xlu0 %1093 }
 0x548   : > { %693 = vst.msk [vmem:[%s4448_s4] sm:$0xff] %vm605_vm2, %v692_v14  ;;  %3365 = vmatmul.mubr.msk.f32.vlgmr.msra.gmra.mrb[0].mxu1 %vm605_vm2, %v692_v14  ;;  %v4523_v14 = vld [vmem:[#allocation10 + $0x50] sm:$0xff] }
 0x549   : > { %3373 = vmatpush3.msra.mxu1 %v864_v12  ;;  %3374 = vmatprep.mubr.msk.f32.mxu1 %vm4008_vm1, %v4005_v16  ;;  %v4519_v12 = vld [vmem:[#allocation10 + $0x10] sm:$0xff] }
 0x54a   : > { %v3713_v18 = vpop.eup %3712  ;;  %3382 = vmatprep.subr.mxu1 %v4005_v16 }
 0x54b   : > { %v860_v19 = vmul.f32 %v3713_v18, %v3709_v6  ;;  %v1018_v20 = vpop.permute.xlu0 %1017  ;;  %v3544_v18 = vpack.c.bf16 %v4521_v13, %v4519_v12 }
 0x54d   : > { %3238 = vst.msk [vmem:[%s4448_s4 + $0x8] sm:$0xff] %vm605_vm2, %v860_v19  ;;  %3375 = vmatmul.mubr.msk.f32.vlgmr.msra.gmra.mrb[2].mxu1 %vm605_vm2, %v860_v19  ;;  %v4528_v19 = vld [vmem:[#allocation10 + $0x70] sm:$0xff] }
 0x54e   : > { %3383 = vmatpush3.msra.mxu1 %v1018_v20  ;;  %3384 = vmatprep.mubr.msk.f32.mxu1 %vm4008_vm1, %v4005_v16  ;;  %v3547_v5 = vpack.c.bf16 %v4528_v19, %v4523_v14  ;;  %v463_v20 = vld [vmem:[%s380_s19] sm:$0xff]  ;;  %s4019_s19 = smov 88  }
 0x54f   : > { %3392 = vmatprep.subr.mxu1 %v4005_v16 }
 0x61b   : > { %v767_v21 = vpop.f32.mrb[0].mxu1 }
 0x61c   : > { %v3366_v23 = vpop.f32.mrb[1].mxu1  ;;  %3385 = vmatmul.mubr.msk.f32.vlgmr.msra.gmra.mrb[4].mxu1 %vm605_vm2, %v767_v21 }
 0x61d   : > { %3394 = vmatprep.mubr.msk.f32.mxu1 %vm4008_vm1, %v4005_v16 }
 0x620   : > { %v935_v24 = vpop.f32.mrb[2].mxu1 }
 0x621   : > { %v3376_v26 = vpop.f32.mrb[3].mxu1  ;;  %3380 = vmatmul.mubr.msk.f32.vlgmr.msra.gmra.mrb[6].mxu0 %vm605_vm2, %v935_v24 }
 0x622   : > { %3388 = vmatpush3.xpose.msk.msra.mxu0 %vm605_vm2, %v1096_v25  ;;  %3389 = vmatprep.mubr.msk.f32.mxu0 %vm4008_vm1, %v4005_v16 }
 0x623   : > { %3397 = vmatprep.subr.mxu0 %v4005_v16 }
 0x625   : > { %3390 = vmatmul.mubr.msk.f32.vlgmr.msra.gmra.mrb[8].mxu0 %vm605_vm2, %v1094_v15  ;;  %v4018_v15 = vmov 0.0|0.0  }
 0x626   : > { %3399 = vmatprep.mubr.msk.f32.mxu0 %vm4008_vm1, %v4005_v16 }
 0x6ef   : > { %v1089_v27 = vpop.f32.mrb[4].mxu1 }
 0x6f0   : > { %v3386_v28 = vpop.f32.mrb[5].mxu1 }
 0x6f4   : > { %v1012_v29 = vpop.f32.mrb[6].mxu0 }
 0x6f5   : > { %v4473_v30 = vadd.f32 %v1089_v27, %v1012_v29  ;;  %v3381_v31 = vpop.f32.mrb[7].mxu0 }
 0x6f8   : > { %v1167_v32 = vpop.f32.mrb[8].mxu0 }
 0x6f9   : > { %v1171_v33 = vsel %vm600_vm3, -1e+10, %v1167_v32  ;;  %v3391_v34 = vpop.f32.mrb[9].mxu0 }
 0x6fa   : > { %v1172_v35 = vsel %vm605_vm2, %v1171_v33, -inf }
 0x6fb   : > { %1173 = vmax.xlane.f32.xlu1 %v1172_v35 }
 0x70c   : > { %1185 = vrot.lane.b32.xlu1 %v4382_v36, %s4014_s13 }
 0x710   : > { %1341 = vrot.lane.b32.xlu1 %v4393_v42, %s4015_s7 }
 0x788   : > { %v1174_v37 = vpop.xlane.xlu1 %1173 }
 0x789   : > { %v1175_v38 = vsub.f32 %v1171_v33, %v1174_v37 }
 0x78b   : > { %v1176_v39 = vmul.f32 1.442695, %v1175_v38 }
 0x78c   : > { %v1186_v40 = vpop.permute.xlu1 %1185 }
 0x78d   : > { %3714 = vpow2.f32 %v1176_v39  ;;  %3393 = vmatpush3.msra.mxu1 %v1186_v40 }
 0x78e   : > { %3402 = vmatprep.subr.mxu1 %v4005_v16 }
 0x790   : > { %v1342_v47 = vpop.permute.xlu1 %1341 }
 0x797   : > { %v3715_v41 = vpop.eup %3714 }
 0x798   : > { %v1178_v43 = vsel %vm605_vm2, %v3715_v41, 0.0 }
 0x799   : > { %1179 = vadd.xlane.f32.xlu0 %v1178_v43 }
 0x7af   : > { %1339 = vrot.lane.b32.xlu0 %v4398_v44, %s4016_s24 }
 0x826   : > { %v1180_v45 = vpop.xlane.xlu0 %1179 }
 0x827   : > { %3716 = vrcp.f32 %v1180_v45 }
 0x82a   : > { %v1340_v49 = vpop.permute.xlu0 %1339 }
 0x831   : > { %v3717_v42 = vpop.eup %3716 }
 0x832   : > { %v1182_v46 = vmul.f32 %v3717_v42, %v3715_v41 }
 0x834   : > { %3244 = vst.msk [vmem:[%s4448_s4 + $0x10] sm:$0xff] %vm605_vm2, %v1182_v46  ;;  %3395 = vmatmul.mubr.msk.f32.vlgmr.msra.gmra.mrb[6].mxu1 %vm605_vm2, %v1182_v46 }
 0x835   : > { %3403 = vmatpush3.xpose.msk.msra.mxu1 %vm605_vm2, %v1342_v47  ;;  %3404 = vmatprep.mubr.msk.f32.mxu1 %vm4008_vm1, %v4005_v16 }
 0x836   : > { %3412 = vmatprep.subr.mxu1 %v4005_v16 }
 0x838   : > { %3405 = vmatmul.mubr.msk.f32.vlgmr.msra.gmra.mrb[8].mxu1 %vm605_vm2, %v1340_v49 }
 0x839   : > { %3414 = vmatprep.mubr.msk.f32.mxu1 %vm4008_vm1, %v4005_v16 }
 0x907   : > { %v1257_v44 = vpop.f32.mrb[6].mxu1 }
 0x908   : > { %v3396_v50 = vpop.f32.mrb[7].mxu1 }
 0x90b   : > { %v1413_v51 = vpop.f32.mrb[8].mxu1 }
 0x90c   : > { %v1417_v52 = vsel %vm600_vm3, -1e+10, %v1413_v51  ;;  %v3406_v53 = vpop.f32.mrb[9].mxu1 }
 0x90d   : > { %v1418_v54 = vsel %vm605_vm2, %v1417_v52, -inf }
 0x90e   : > { %1419 = vmax.xlane.f32.xlu1 %v1418_v54 }
 0x91f   : > { %1431 = vrot.lane.b32.xlu1 %v4382_v36, %s4017_s21 }
 0x923   : > { %1508 = vrot.lane.b32.xlu1 %v4363_v10, %s4006_s27 }
 0x99b   : > { %v1420_v55 = vpop.xlane.xlu1 %1419 }
 0x99c   : > { %v1421_v56 = vsub.f32 %v1417_v52, %v1420_v55 }
 0x99e   : > { %v1422_v57 = vmul.f32 1.442695, %v1421_v56 }
 0x99f   : > { %v1432_v36 = vpop.permute.xlu1 %1431 }
 0x9a0   : > { %3718 = vpow2.f32 %v1422_v57 }
 0x9a3   : > { %v1509_v63 = vpop.permute.xlu1 %1508 }
 0x9a4   : > { %3413 = vmatpush3.msra.mxu1 %v1509_v63 }
 0x9a5   : > { %3543 = vmatprep.subr.bf16.mxu1 %v4018_v15 }
 0x9aa   : > { %v3719_v58 = vpop.eup %3718 }
 0x9ab   : > { %v1424_v59 = vsel %vm605_vm2, %v3719_v58, 0.0 }
 0x9ac   : > { %1425 = vadd.xlane.f32.xlu0 %v1424_v59 }
 0x9c2   : > { %1262 = vrot.lane.b32.xlu0 %v4361_v9, %s4006_s27 }
 0x9c6   : > { %1590 = vrot.lane.b32.xlu0 %v3252_v1, %s4006_s27 }
 0x9ca   : > { %3675 = vrot.lane.b32.xlu0 %v3674_v11, %s4007_s2 }
 0x9ce   : > { %3680 = vrot.lane.b32.xlu0 %v3679_v4, %s4007_s2 }
 0x9d2   : > { %1797 = vrot.lane.b32.xlu0 %v4370_v17, %s4004_s11 }
 0x9d6   : > { %1630 = vrot.lane.b32.xlu0 %v3252_v1, %s4007_s2 }
 0xa39   : > { %v1426_v48 = vpop.xlane.xlu0 %1425 }
 0xa3a   : > { %3720 = vrcp.f32 %v1426_v48  ;;  %v4593_v48 = vld [vmem:[%s389_s17] sm:$0xff]  ;;  %s4020_s17 = smov 80  }
 0xa3b   : > { %vm1807_vm4 = vcmp.gt.f32.partialorder %v4593_v48, 0.5 }
 0xa3d   : > { %v1263_v60 = vpop.permute.xlu0 %1262 }
 0xa3e   : > { %3398 = vmatpush3.msra.mxu0 %v1263_v60 }
 0xa3f   : > { %3400 = vmatmul.mubr.msk.f32.vlgmr.msra.gmra.mrb[10].mxu0 %vm605_vm2, %v1257_v44  ;;  %3407 = vmatprep.subr.mxu0 %v4005_v16 }
 0xa40   : > { %3408 = vmatpush3.msra.mxu0 %v1432_v36  ;;  %3409 = vmatprep.mubr.msk.f32.mxu0 %vm4008_vm1, %v4005_v16 }
 0xa41   : > { %3537 = vmatprep.subr.bf16.mxu0 %v4018_v15  ;;  %v1591_v10 = vpop.permute.xlu0 %1590 }
 0xa44   : > { %v3721_v61 = vpop.eup %3720 }
 0xa45   : > { %v1428_v62 = vmul.f32 %v3721_v61, %v3719_v58  ;;  %v3676_v28 = vpop.permute.xlu0 %3675 }
 0xa46   : > { %v3678_v29 = vunpack.i.h.bf16 %v3676_v28 }
 0xa47   : > { %3249 = vst.msk [vmem:[%s4448_s4 + $0x18] sm:$0xff] %vm605_vm2, %v1428_v62  ;;  %3410 = vmatmul.mubr.msk.f32.vlgmr.msra.gmra.mrb[12].mxu0 %vm605_vm2, %v1428_v62 }
 0xa48   : > { %3425 = vmatprep.mubr.msk.f32.mxu0 %vm4008_vm1, %v4005_v16 }
 0xa49   : > { %v3681_v32 = vpop.permute.xlu0 %3680 }
 0xa4a   : > { %v3683_v33 = vunpack.i.h.bf16 %v3681_v32  ;;  %v3682_v34 = vunpack.i.l.bf16 %v3681_v32 }
 0xa4c   : > { %v3541_v35 = vpack.c.bf16 %v3683_v33, %v3682_v34 }
 0xa4d   : > { %v1798_v38 = vpop.permute.xlu0 %1797 }
 0xa51   : > { %v1631_v44 = vpop.permute.xlu0 %1630 }
 0xb12   : > { %v1334_v2 = vpop.f32.mrb[10].mxu0 }
 0xb13   : > { %v1338_v3 = vadd.f32 %v1334_v2, %v4473_v30  ;;  %v3401_v6 = vpop.f32.mrb[11].mxu0  ;;  %v3677_v30 = vunpack.i.l.bf16 %v3676_v28 }
 0xb15   : > { %v3538_v31 = vpack.c.bf16 %v3678_v29, %v3677_v30 }
 0xb17   : > { %3539 = vmatpush3.bf16.msra.mxu0 %v3538_v31 }
 0xb18   : > { %3540 = vmatprep.subr.bf16.mxu0 %v4018_v15 }
 0xb1a   : > { %v1503_v7 = vpop.f32.mrb[12].mxu0 }
 0xb1b   : > { %v3411_v8 = vpop.f32.mrb[13].mxu0  ;;  %3415 = vmatmul.mubr.msk.f32.vlgmr.msra.gmra.mrb[10].mxu1 %vm605_vm2, %v1503_v7  ;;  %3542 = vmatpush3.bf16.msra.mxu0 %v3541_v35 }
 0xb1c   : > { %3436 = vmatprep.mubr.msk.f32.mxu1 %vm4008_vm1, %v4005_v16  ;;  %3545 = vmatpush3.bf16.msra.mxu1 %v3544_v18 }
 0xb1d   : > { %3546 = vmatprep.subr.bf16.mxu1 %v4018_v15  ;;  %3439 = vmatprep.subr.mxu0 %v4005_v16 }
 0xb20   : > { %3548 = vmatpush3.bf16.msra.mxu1 %v3547_v5 }
 0xb21   : > { %3444 = vmatprep.subr.mxu1 %v4005_v16 }
 0xb23   : > { %3437 = vmatmul.mubr.msk.f32.vlgmr.msra.gmra.mrb[12].mxu1 %vm467_vm0, %v463_v20 }
 0xb24   : > { %3446 = vmatprep.mubr.msk.f32.mxu1 %vm4008_vm1, %v4005_v16 }
 0xbee   : > { %v1580_v9 = vpop.f32.mrb[10].mxu1 }
 0xbef   : > { %v1584_v21 = vadd.f32 %v1580_v9, %v1338_v3  ;;  %v3416_v23 = vpop.f32.mrb[11].mxu1 }
 0xbf1   : > { %v1593_v24 = vadd.f32 %v1591_v10, %v1584_v21 }
 0xbf3   : > { %v4548_v25 = vadd.f32 %v1593_v24, %v4350_v0  ;;  %v4555_v0 = vld [vmem:[#allocation11 + $0x2] ss:$0 sm:$0xff] }
 0xbf5   : > { %v1595_v26 = vmul.f32 %v4548_v25, %v4548_v25 }
 0xbf6   : > { %v1786_v37 = vpop.f32.mrb[12].mxu1 }
 0xbf7   : > { %v1596_v27 = vsel %vm467_vm0, %v1595_v26, 0.0  ;;  %v4558_v39 = vadd.f32 %v4555_v0, %v1786_v37  ;;  %v3438_v40 = vpop.f32.mrb[13].mxu1 }
 0xbf8   : > { %1597 = vadd.xlane.f32.xlu1 %v1596_v27 }
 0xbf9   : > { %v1800_v41 = vmul.f32 %v1798_v38, %v4558_v39  ;;  %v1796_v50 = vmul.f32 %v4558_v39, %v4370_v17 }
 0xbfb   : > { %1802 = vrot.lane.b32.xlu0 %v1800_v41, %s4007_s2 }
 0xc6d   : > { %v1803_v51 = vpop.permute.xlu0 %1802 }
 0xc6e   : > { %v4569_v52 = vadd.f32 %v1803_v51, %v1796_v50 }
 0xc85   : > { %v1598_v43 = vpop.xlane.xlu1 %1597 }
 0xc86   : > { %v1599_v45 = vmul.f32 0.03125, %v1598_v43 }
 0xc88   : > { %v1600_v42 = vadd.f32 1e-06, %v1599_v45 }
 0xc8a   : > { %3722 = vrsqrt.f32 %v1600_v42 }
 0xc94   : > { %v3723_v46 = vpop.eup %3722 }
 0xc95   : > { %v1602_v47 = vmul.f32 %v3723_v46, %v4548_v25 }
 0xc97   : > { %v1603_v49 = vmul.f32 %v1602_v47, %v4377_v22 }
 0xc99   : > { %3426 = vmatmul.mubr.msk.f32.vlgmr.msra.gmra.mrb[14].mxu0 %vm467_vm0, %v1603_v49 }
 0xc9a   : > { %3441 = vmatprep.mubr.msk.f32.mxu0 %vm4008_vm1, %v4005_v16  ;;  %3440 = vmatpush3.xpose.msk.msra.mxu0 %vm605_vm2, %v4569_v52 }
 0xc9b   : > { %3449 = vmatprep.subr.mxu0 %v4005_v16 }
 0xd6c   : > { %v1702_v53 = vpop.f32.mrb[14].mxu0 }
 0xd6d   : > { %v1703_v54 = vadd.f32 %v1702_v53, %v1631_v44  ;;  %v3427_v55 = vpop.f32.mrb[15].mxu0 }
 0xd6f   : > { %v1790_v56 = vmul.f32 %v1703_v54, %v4370_v17 }
 0xd71   : > { %1792 = vrot.lane.b32.xlu0 %v1790_v56, %s4006_s27 }
 0xd75   : > { %1977 = vrot.lane.b32.xlu0 %v4569_v52, %s4010_s8 }
 0xde3   : > { %v1793_v57 = vpop.permute.xlu0 %1792 }
 0xde4   : > { %v4578_v58 = vadd.f32 %v1793_v57, %v1790_v56 }
 0xde6   : > { %1975 = vrot.lane.b32.xlu0 %v4578_v58, %s4010_s8  ;;  %3442 = vmatmul.mubr.msk.f32.vlgmr.msra.gmra.mrb[16].mxu0 %vm605_vm2, %v4578_v58  ;;  %s445_s8 = scalar_lea.vmem [#allocation13], %s4327_s23  ;;  %s4022_s23 = smov [#allocation13]  }
 0xde7   : > { %v1978_v59 = vpop.permute.xlu0 %1977  ;;  %3451 = vmatprep.mubr.msk.f32.mxu0 %vm4008_vm1, %v4005_v16  ;;  %s3026_s30 = sshll.u32 %s445_s8, 4  ;;  %s4711_s30 = int_to_ptr.vmem [resolvable:$true] %s3026_s30 }
 0xde8   : > { %3450 = vmatpush3.xpose.msk.msra.mxu0 %vm605_vm2, %v1978_v59 }
 0xde9   : > { %3459 = vmatprep.subr.mxu0 %v4005_v16 }
 0xe58   : > { %v1976_v17 = vpop.permute.xlu0 %1975 }
 0xe59   : > { %3452 = vmatmul.mubr.msk.f32.vlgmr.msra.gmra.mrb[18].mxu0 %vm605_vm2, %v1976_v17 }
 0xe5a   : > { %3461 = vmatprep.mubr.msk.f32.mxu0 %vm4008_vm1, %v4005_v16 }
 0xeb9   : > { %v1880_v60 = vpop.f32.mrb[16].mxu0 }
 0xeba   : > { %v1884_v36 = vsel %vm1807_vm4, -1e+10, %v1880_v60  ;;  %v3443_v61 = vpop.f32.mrb[17].mxu0 }
 0xebb   : > { %v1885_v62 = vsel %vm605_vm2, %v1884_v36, -inf }
 0xebc   : > { %1886 = vmax.xlane.f32.xlu0 %v1885_v62 }
 0xed2   : > { %2067 = vrot.lane.b32.xlu0 %v4558_v39, %s4019_s19 }
 0xf2c   : > { %v2049_v63 = vpop.f32.mrb[18].mxu0 }
 0xf2d   : > { %v2053_v1 = vsel %vm1807_vm4, -1e+10, %v2049_v63  ;;  %v3453_v2 = vpop.f32.mrb[19].mxu0 }
 0xf2e   : > { %v2054_v3 = vsel %vm605_vm2, %v2053_v1, -inf }
 0xf2f   : > { %2055 = vmax.xlane.f32.xlu1 %v2054_v3 }
 0xf49   : > { %v1887_v6 = vpop.xlane.xlu0 %1886 }
 0xf4a   : > { %v1888_v7 = vsub.f32 %v1884_v36, %v1887_v6 }
 0xf4c   : > { %v1889_v8 = vmul.f32 1.442695, %v1888_v7 }
 0xf4d   : > { %v2068_v28 = vpop.permute.xlu0 %2067 }
 0xf4e   : > { %3724 = vpow2.f32 %v1889_v8 }
 0xf58   : > { %v3725_v11 = vpop.eup %3724 }
 0xf59   : > { %v1891_v18 = vsel %vm605_vm2, %v3725_v11, 0.0 }
 0xf5a   : > { %1892 = vadd.xlane.f32.xlu1 %v1891_v18 }
 0xfbc   : > { %v2056_v4 = vpop.xlane.xlu1 %2055 }
 0xfbd   : > { %v2057_v5 = vsub.f32 %v2053_v1, %v2056_v4 }
 0xfbf   : > { %v2058_v20 = vmul.f32 1.442695, %v2057_v5 }
 0xfc1   : > { %3726 = vpow2.f32 %v2058_v20 }
 0xfcb   : > { %v3727_v9 = vpop.eup %3726 }
 0xfcc   : > { %v2060_v10 = vsel %vm605_vm2, %v3727_v9, 0.0 }
 0xfcd   : > { %2061 = vadd.xlane.f32.xlu1 %v2060_v10 }
 0xfde   : > { %1899 = vrot.lane.b32.xlu1 %v4558_v39, %s4006_s27  ;;  %s4021_s27 = smov 72  }
 0xfe2   : > { %2144 = vrot.lane.b32.xlu1 %v4521_v13, %s4004_s11 }
 0xfe6   : > { %2299 = vrot.lane.b32.xlu1 %v4569_v52, %s4013_s12 }
 0xfe7   : > { %v1893_v21 = vpop.xlane.xlu1 %1892 }
 0xfe8   : > { %3728 = vrcp.f32 %v1893_v21 }
 0xfea   : > { %2297 = vrot.lane.b32.xlu1 %v4578_v58, %s4013_s12  ;;  %s3920_s12 = sshll.u32 %s4022_s23, 4  ;;  %s3921_s12 = int_to_ptr.vmem [resolvable:$false] %s3920_s12 }
 0xfeb   : > { %s3922_s26 = scalar_lea.vmem %s3921_s12, 256  ;;  %p3923_p6 = scmp.lt.s32.totalorder %s4711_s30, %s3921_s12 }
 0xff2   : > { %v3729_v23 = vpop.eup %3728 }
 0xff3   : > { %v1895_v24 = vmul.f32 %v3729_v23, %v3725_v11 }
 0xff5   : > { %3259 = vst.msk [vmem:[%s4448_s4 + $0x20] sm:$0xff] %vm605_vm2, %v1895_v24 }
0x105a   : > { %v2062_v26 = vpop.xlane.xlu1 %2061 }
0x105b   : > { %3730 = vrcp.f32 %v2062_v26 }
0x105e   : > { %v1900_v27 = vpop.permute.xlu1 %1899 }
0x105f   : > { %3445 = vmatpush3.msra.mxu1 %v1900_v27 }
0x1060   : > { %3447 = vmatmul.mubr.msk.f32.vlgmr.msra.gmra.mrb[14].mxu1 %vm605_vm2, %v1895_v24  ;;  %3454 = vmatprep.subr.mxu1 %v4005_v16 }
0x1061   : > { %3455 = vmatpush3.msra.mxu1 %v2068_v28  ;;  %3456 = vmatprep.mubr.msk.f32.mxu1 %vm4008_vm1, %v4005_v16 }
0x1062   : > { %v2145_v13 = vpop.permute.xlu1 %2144  ;;  %3464 = vmatprep.subr.mxu1 %v4005_v16 }
0x1063   : > { %3460 = vmatpush3.msra.mxu0 %v2145_v13  ;;  %v2803_v13 = vld [vmem:[#allocation10 + $0x18] sm:$0xff] }
0x1064   : > { %3469 = vmatprep.subr.mxu0 %v4005_v16 }
0x1065   : > { %v3731_v29 = vpop.eup %3730 }
0x1066   : > { %v2064_v30 = vmul.f32 %v3731_v29, %v3727_v9  ;;  %v2300_v33 = vpop.permute.xlu1 %2299  ;;  %v2804_v29 = vld [vmem:[#allocation10 + $0x38] sm:$0xff] }
0x1068   : > { %3263 = vst.msk [vmem:[%s4448_s4 + $0x28] sm:$0xff] %vm605_vm2, %v2064_v30  ;;  %3457 = vmatmul.mubr.msk.f32.vlgmr.msra.gmra.mrb[16].mxu1 %vm605_vm2, %v2064_v30  ;;  %v3550_v30 = vpack.c.bf16 %v2804_v29, %v2803_v13 }
0x1069   : > { %3466 = vmatprep.mubr.msk.f32.mxu1 %vm4008_vm1, %v4005_v16 }
0x106a   : > { %v2298_v37 = vpop.permute.xlu1 %2297 }
0x1133   : > { %v1971_v31 = vpop.f32.mrb[14].mxu1 }
0x1134   : > { %v3448_v32 = vpop.f32.mrb[15].mxu1 }
0x113b   : > { %v2139_v34 = vpop.f32.mrb[16].mxu1 }
0x113c   : > { %v3458_v35 = vpop.f32.mrb[17].mxu1  ;;  %3462 = vmatmul.mubr.msk.f32.vlgmr.msra.gmra.mrb[20].mxu0 %vm605_vm2, %v2139_v34  ;;  %v2892_v34 = vld [vmem:[#allocation10 + $0x98] sm:$0xff] }
0x113d   : > { %3470 = vmatpush3.xpose.msk.msra.mxu0 %vm605_vm2, %v2300_v33  ;;  %3471 = vmatprep.mubr.msk.f32.mxu0 %vm4008_vm1, %v4005_v16  ;;  %v3684_v33 = vpack.i.bf16 %v2804_v29, %v2803_v13  ;;  %v2893_v35 = vld [vmem:[#allocation10 + $0xb8] sm:$0xff] }
0x113e   : > { %3479 = vmatprep.subr.mxu0 %v4005_v16 }
0x1140   : > { %3472 = vmatmul.mubr.msk.f32.vlgmr.msra.gmra.mrb[22].mxu0 %vm605_vm2, %v2298_v37  ;;  %v3694_v37 = vpack.i.bf16 %v2893_v35, %v2892_v34 }
0x1141   : > { %3481 = vmatprep.mubr.msk.f32.mxu0 %vm4008_vm1, %v4005_v16 }
0x120f   : > { %v2216_v38 = vpop.f32.mrb[20].mxu0 }
0x1210   : > { %v3463_v40 = vpop.f32.mrb[21].mxu0 }
0x1211   : > { %v2895_v40 = vld [vmem:[#allocation10 + $0xf8] sm:$0xff] }
0x1213   : > { %v2371_v41 = vpop.f32.mrb[22].mxu0 }
0x1214   : > { %v2375_v43 = vsel %vm1807_vm4, -1e+10, %v2371_v41  ;;  %v3473_v45 = vpop.f32.mrb[23].mxu0 }
0x1215   : > { %v2376_v42 = vsel %vm605_vm2, %v2375_v43, -inf }
0x1216   : > { %2377 = vmax.xlane.f32.xlu1 %v2376_v42 }
0x1227   : > { %2221 = vrot.lane.b32.xlu1 %v4519_v12, %s4004_s11 }
0x122b   : > { %2545 = vrot.lane.b32.xlu1 %v4569_v52, %s4016_s24 }
0x122f   : > { %2543 = vrot.lane.b32.xlu1 %v4578_v58, %s4016_s24 }
0x12a3   : > { %v2378_v46 = vpop.xlane.xlu1 %2377 }
0x12a4   : > { %v2379_v47 = vsub.f32 %v2375_v43, %v2378_v46  ;;  %v3277_v43 = vld [vmem:[#allocation11 + $0x3] ss:$0 sm:$0xff] }
0x12a6   : > { %v2380_v49 = vmul.f32 1.442695, %v2379_v47 }
0x12a7   : > { %v2222_v44 = vpop.permute.xlu1 %2221 }
0x12a8   : > { %3732 = vpow2.f32 %v2380_v49  ;;  %3465 = vmatpush3.msra.mxu1 %v2222_v44 }
0x12a9   : > { %3467 = vmatmul.mubr.msk.f32.vlgmr.msra.gmra.mrb[18].mxu1 %vm605_vm2, %v1971_v31  ;;  %3474 = vmatprep.subr.mxu1 %v4005_v16  ;;  %v2806_v31 = vld [vmem:[#allocation10 + $0x78] sm:$0xff] }
0x12aa   : > { %3476 = vmatprep.mubr.msk.f32.mxu1 %vm4008_vm1, %v4005_v16 }
0x12ab   : > { %v2546_v54 = vpop.permute.xlu1 %2545 }
0x12af   : > { %v2544_v56 = vpop.permute.xlu1 %2543 }
0x12b2   : > { %v3733_v12 = vpop.eup %3732 }
0x12b3   : > { %v2382_v50 = vsel %vm605_vm2, %v3733_v12, 0.0 }
0x12b4   : > { %2383 = vadd.xlane.f32.xlu0 %v2382_v50 }
0x12ca   : > { %2389 = vrot.lane.b32.xlu0 %v4558_v39, %s4020_s17 }
0x1341   : > { %v2384_v51 = vpop.xlane.xlu0 %2383 }
0x1342   : > { %3734 = vrcp.f32 %v2384_v51 }
0x1345   : > { %v2390_v52 = vpop.permute.xlu0 %2389 }
0x1346   : > { %3475 = vmatpush3.msra.mxu1 %v2390_v52 }
0x1347   : > { %3484 = vmatprep.subr.mxu1 %v4005_v16 }
0x134c   : > { %v3735_v53 = vpop.eup %3734 }
0x134d   : > { %v2386_v55 = vmul.f32 %v3735_v53, %v3733_v12 }
0x134f   : > { %3269 = vst.msk [vmem:[%s4448_s4 + $0x30] sm:$0xff] %vm605_vm2, %v2386_v55  ;;  %3477 = vmatmul.mubr.msk.f32.vlgmr.msra.gmra.mrb[20].mxu1 %vm605_vm2, %v2386_v55 }
0x1350   : > { %3485 = vmatpush3.xpose.msk.msra.mxu1 %vm605_vm2, %v2546_v54  ;;  %3486 = vmatprep.mubr.msk.f32.mxu1 %vm4008_vm1, %v4005_v16 }
0x1351   : > { %3494 = vmatprep.subr.mxu1 %v4005_v16 }
0x1353   : > { %3487 = vmatmul.mubr.msk.f32.vlgmr.msra.gmra.mrb[22].mxu1 %vm605_vm2, %v2544_v56 }
0x1354   : > { %3496 = vmatprep.mubr.msk.f32.mxu1 %vm4008_vm1, %v4005_v16 }
0x137c   : > { %v2293_v57 = vpop.f32.mrb[18].mxu1 }
0x137d   : > { %v2294_v58 = vadd.f32 %v2293_v57, %v2216_v38  ;;  %v3468_v59 = vpop.f32.mrb[19].mxu1  ;;  %v2894_v38 = vld [vmem:[#allocation10 + $0xd8] sm:$0xff] }
0x137e   : > { %v3699_v41 = vpack.i.bf16 %v2895_v40, %v2894_v38 }
0x1422   : > { %v2461_v17 = vpop.f32.mrb[20].mxu1 }
0x1423   : > { %v3478_v60 = vpop.f32.mrb[21].mxu1 }
0x1426   : > { %v2617_v36 = vpop.f32.mrb[22].mxu1 }
0x1427   : > { %v2621_v61 = vsel %vm1807_vm4, -1e+10, %v2617_v36  ;;  %v3488_v62 = vpop.f32.mrb[23].mxu1 }
0x1428   : > { %v2622_v63 = vsel %vm605_vm2, %v2621_v61, -inf }
0x1429   : > { %2623 = vmax.xlane.f32.xlu1 %v2622_v63 }
0x143a   : > { %2635 = vrot.lane.b32.xlu1 %v4558_v39, %s4021_s27 }
0x143e   : > { %2712 = vrot.lane.b32.xlu1 %v4528_v19, %s4004_s11 }
0x14b6   : > { %v2624_v1 = vpop.xlane.xlu1 %2623 }
0x14b7   : > { %v2625_v2 = vsub.f32 %v2621_v61, %v2624_v1 }
0x14b9   : > { %v2626_v3 = vmul.f32 1.442695, %v2625_v2 }
0x14ba   : > { %v2636_v19 = vpop.permute.xlu1 %2635 }
0x14bb   : > { %3736 = vpow2.f32 %v2626_v3 }
0x14c5   : > { %v3737_v6 = vpop.eup %3736 }
0x14c6   : > { %v2628_v7 = vsel %vm605_vm2, %v3737_v6, 0.0 }
0x14c7   : > { %2629 = vadd.xlane.f32.xlu0 %v2628_v7 }
0x14dd   : > { %2466 = vrot.lane.b32.xlu0 %v4523_v14, %s4004_s11 }
0x14e1   : > { %2789 = vrot.lane.b32.xlu0 %v4555_v0, %s4004_s11  ;;  %v2713_v0 = vpop.permute.xlu1 %2712  ;;  %s4824_s11 = sld [smem:[#allocation24_spill]] }
0x14e2   : > { %3495 = vmatpush3.msra.mxu1 %v2713_v0 }
0x14e3   : > { %3555 = vmatprep.subr.bf16.mxu1 %v4018_v15 }
0x14e5   : > { %3685 = vrot.lane.b32.xlu0 %v3684_v33, %s4007_s2 }
0x14e7   : > { %p4826_p0 = scmp.ne.s32.totalorder %s4824_s11, 0 }
0x1554   : > { %v2630_v48 = vpop.xlane.xlu0 %2629 }
0x1555   : > { %3738 = vrcp.f32 %v2630_v48 }
0x1558   : > { %v2467_v39 = vpop.permute.xlu0 %2466 }
0x1559   : > { %3480 = vmatpush3.msra.mxu0 %v2467_v39 }
0x155a   : > { %3482 = vmatmul.mubr.msk.f32.vlgmr.msra.gmra.mrb[24].mxu0 %vm605_vm2, %v2461_v17  ;;  %3489 = vmatprep.subr.mxu0 %v4005_v16 }
0x155b   : > { %3490 = vmatpush3.msra.mxu0 %v2636_v19  ;;  %3491 = vmatprep.mubr.msk.f32.mxu0 %vm4008_vm1, %v4005_v16 }
0x155c   : > { %3549 = vmatprep.subr.bf16.mxu0 %v4018_v15  ;;  %v2790_v10 = vpop.permute.xlu0 %2789 }
0x155f   : > { %v3739_v8 = vpop.eup %3738 }
0x1560   : > { %v2632_v14 = vmul.f32 %v3739_v8, %v3737_v6  ;;  %v3686_v47 = vpop.permute.xlu0 %3685 }
0x1561   : > { %v3688_v49 = vunpack.i.h.bf16 %v3686_v47  ;;  %v3687_v44 = vunpack.i.l.bf16 %v3686_v47 }
0x1562   : > { %3274 = vst.msk [vmem:[%s4448_s4 + $0x38] sm:$0xff] %vm605_vm2, %v2632_v14  ;;  %3492 = vmatmul.mubr.msk.f32.vlgmr.msra.gmra.mrb[26].mxu0 %vm605_vm2, %v2632_v14 }
0x1563   : > { %3507 = vmatprep.mubr.msk.f32.mxu0 %vm4008_vm1, %v4005_v16  ;;  %3551 = vmatpush3.bf16.msra.mxu0 %v3550_v30  ;;  %v3556_v12 = vpack.c.bf16 %v3688_v49, %v3687_v44 }
0x1564   : > { %3552 = vmatprep.subr.bf16.mxu0 %v4018_v15 }
0x162d   : > { %v2538_v11 = vpop.f32.mrb[24].mxu0 }
0x162e   : > { %v2542_v18 = vadd.f32 %v2538_v11, %v2294_v58  ;;  %v3483_v4 = vpop.f32.mrb[25].mxu0 }
0x1635   : > { %v2707_v5 = vpop.f32.mrb[26].mxu0 }
0x1636   : > { %v3493_v20 = vpop.f32.mrb[27].mxu0  ;;  %3497 = vmatmul.mubr.msk.f32.vlgmr.msra.gmra.mrb[24].mxu1 %vm605_vm2, %v2707_v5 }
0x1637   : > { %3526 = vmatprep.mubr.msk.f32.mxu1 %vm4008_vm1, %v4005_v16  ;;  %v2805_v16 = vld [vmem:[#allocation10 + $0x58] sm:$0xff]  ;;  %3557 = vmatpush3.bf16.msra.mxu1 %v3556_v12 }
0x1638   : > { %v3553_v32 = vpack.c.bf16 %v2806_v31, %v2805_v16  ;;  %3558 = vmatprep.subr.bf16.mxu1 %v4018_v15 }
0x163a   : > { %3554 = vmatpush3.bf16.msra.mxu0 %v3553_v32 }
0x1709   : > { %v2784_v9 = vpop.f32.mrb[24].mxu1 }
0x170a   : > { %v2788_v21 = vadd.f32 %v2784_v9, %v2542_v18  ;;  %v3498_v23 = vpop.f32.mrb[25].mxu1 }
0x170c   : > { %v2792_v24 = vadd.f32 %v2790_v10, %v2788_v21 }
0x170e   : > { %v4686_v26 = vadd.f32 %v2792_v24, %v4548_v25  ;;  %v3689_v25 = vpack.i.bf16 %v2806_v31, %v2805_v16 }
0x1710   : > { %v2794_v27 = vmul.f32 %v4686_v26, %v4686_v26  ;;  %3690 = vrot.lane.b32.xlu0 %v3689_v25, %s4007_s2 }
0x1712   : > { %v2795_v28 = vsel %vm467_vm0, %v2794_v27, 0.0 }
0x1713   : > { %2796 = vadd.xlane.f32.xlu1 %v2795_v28 }
0x1714   : > { %3695 = vrot.lane.b32.xlu0 %v3694_v37, %s4007_s2 }
0x1718   : > { %3700 = vrot.lane.b32.xlu0 %v3699_v41, %s4007_s2 }
0x171c   : > { %2928 = vrot.lane.b32.xlu0 %v3277_v43, %s4007_s2  ;;  %s3281_s2 = sshll.u32 %s4089_s9, 7  ;;  %s3916_s9 = scalar_lea.vmem %s4711_s30, 128 }
0x171d   : > { %s4709_s20 = scalar_lea.hbm %s4825_s25, %s3281_s2  ;;  %p3917_p7 = scmp.ne.s32.totalorder %s4711_s30, %s3916_s9 }
0x171e   : > { %p3924_p12 = scmp.lt.s32.totalorder %s3922_s26, %s3916_s9 }
0x171f   : > { %p3918_p11 = pnand %p3917_p7, %p4826_p0 }
0x1720   : > { %p3925_p13 = por %p3924_p12, %p3923_p6 }
0x1721   : > { %p3919_p1 = pneg %p3918_p11 }
0x1723   : > { %p3926_p9 = pnand %p3925_p13, %p3919_p1 }
0x1782   : > { %v3691_v50 = vpop.permute.xlu0 %3690 }
0x1783   : > { %v3693_v51 = vunpack.i.h.bf16 %v3691_v50  ;;  %v3692_v52 = vunpack.i.l.bf16 %v3691_v50 }
0x1785   : > { %v3559_v54 = vpack.c.bf16 %v3693_v51, %v3692_v52 }
0x1786   : > { %v3696_v56 = vpop.permute.xlu0 %3695 }
0x1787   : > { %v3698_v57 = vunpack.i.h.bf16 %v3696_v56  ;;  %v3697_v58 = vunpack.i.l.bf16 %v3696_v56  ;;  %3560 = vmatpush3.bf16.msra.mxu1 %v3559_v54 }
0x1788   : > { %3561 = vmatprep.subr.bf16.mxu1 %v4018_v15 }
0x1789   : > { %v3562_v17 = vpack.c.bf16 %v3698_v57, %v3697_v58 }
0x178a   : > { %v3701_v60 = vpop.permute.xlu0 %3700 }
0x178b   : > { %v3703_v36 = vunpack.i.h.bf16 %v3701_v60  ;;  %v3702_v61 = vunpack.i.l.bf16 %v3701_v60  ;;  %3563 = vmatpush3.bf16.msra.mxu1 %v3562_v17 }
0x178c   : > { %3564 = vmatprep.subr.bf16.mxu1 %v4018_v15 }
0x178d   : > { %v3565_v62 = vpack.c.bf16 %v3703_v36, %v3702_v61 }
0x178e   : > { %v2929_v3 = vpop.permute.xlu0 %2928 }
0x178f   : > { %3566 = vmatpush3.bf16.msra.mxu1 %v3565_v62 }
0x17a0   : > { %v2797_v45 = vpop.xlane.xlu1 %2796 }
0x17a1   : > { %v2798_v42 = vmul.f32 0.03125, %v2797_v45 }
0x17a3   : > { %v2799_v46 = vadd.f32 1e-06, %v2798_v42 }
0x17a5   : > { %3740 = vrsqrt.f32 %v2799_v46 }
0x17af   : > { %v3741_v53 = vpop.eup %3740 }
0x17b0   : > { %v2801_v55 = vmul.f32 %v3741_v53, %v4686_v26 }
0x17b2   : > { %v2802_v59 = vmul.f32 %v2801_v55, %v4377_v22 }
0x17b4   : > { %3508 = vmatmul.mubr.msk.f32.vlgmr.msra.gmra.mrb[28].mxu0 %vm467_vm0, %v2802_v59 }
0x1887   : > { %v2883_v63 = vpop.f32.mrb[28].mxu0 }
0x1888   : > { %v2884_v1 = vadd.f32 %v3277_v43, %v2883_v63  ;;  %v3509_v2 = vpop.f32.mrb[29].mxu0 }
0x188a   : > { %v2887_v22 = vmax.f32 %v2884_v1, 0.0 }
0x188c   : > { %3527 = vmatmul.mubr.msk.f32.vlgmr.msra.gmra.mrb[26].mxu1 %vm2931_vm5, %v2887_v22 }
0x195f   : > { %v3001_v6 = vpop.f32.mrb[26].mxu1 }
0x1960   : > { %v3002_v7 = vadd.f32 %v3001_v6, %v2929_v3  ;;  %v3528_v48 = vpop.f32.mrb[27].mxu1 }
0x1962   : > { %v3005_v39 = vadd.f32 %v3002_v7, %v4686_v26 }
0x1964   : > { %3006 = vst.msk [vmem:[%s445_s8] sm:$0xff] %vm467_vm0, %v3005_v39 }
0x1965   : > { %3929 = shalt.err (!%p3926_p9)
}
0x1966   : > { %s3930_s16 = scalar_lea.hbm %s4709_s20, 128  ;;  %s3934_s14 = scalar_lea.hbm %s4825_s25, 256 }
0x1967   : > { %p3931_p3 = scmp.ne.s32.totalorder %s4709_s20, %s3930_s16  ;;  %p3935_p10 = scmp.lt.u32.totalorder %s4709_s20, %s4825_s25 }
0x1968   : > { %p3936_p2 = scmp.lt.u32.totalorder %s3934_s14, %s3930_s16  ;;  %p3938_p7 = scmp.lt.u32.totalorder %s3930_s16, %s4709_s20 }
0x1969   : > { %p3932_p8 = pnand %p3931_p3, %p4826_p0 }
0x196a   : > { %p3937_p4 = por %p3936_p2, %p3935_p10 }
0x196b   : > { %p3933_p5 = pneg %p3932_p8 }
0x196c   : > { %p3939_p11 = por %p3938_p7, %p3937_p4 }
0x196e   : > { %p3940_p1 = pnand %p3939_p11, %p3933_p5 }
0x1970   : > { %3943 = shalt.err (!%p3940_p1)
}
0x1971   : > { %3585 = dma.vmem_to_hbm [thread:$0]  (%p4826_p0), %s4711_s30, 128, %s4709_s20, %s3008_s10  }
0x1972 PF: > { %s4827_s7 = sld [smem:[#allocation19_spill]]  ;;  %s4828_s24 = sld [smem:[#allocation21_spill]] }
0x1973   : > { %s4829_s21 = sld [smem:[#allocation20_spill]] }
0x1978   : > { %s3041_s19 = sand.u32 1, %s4827_s7   ;;  %p4830_p6 = scmp.ne.s32.totalorder %s4828_s24, 0 }
0x1979   : > { %p4831_p12 = scmp.ge.s32.totalorder %s4829_s21, 2  ;;  %s3042_s17 = scalar_lea.sflag [#allocation4], %s3041_s19 }
0x197b   : > { %p3608_p13 = pnand %p4831_p12, %p4830_p6 }
0x197d   : > { %3977 = dma.done.wait (!%p3608_p13), %s3042_s17, 128  }
0x197e   : > { %3979 = vsyncadd (!%p3608_p13), %s3042_s17, 4294967168  ;;  %s4832_s30 = sld [smem:[#allocation22_spill]]  ;;  %s4833_s2 = sld [smem:[#allocation23_spill]] }
0x197f   : > { %s4834_s27 = smov %s3986_s28  ;;  %s4835_s28 = smov %s3990_s29 }
0x1984   : > { %p27_p9 = scmp.ge.s32.totalorder %s4832_s30, 4   ;;  %s4836_s29 = smov %s4833_s2 }
0x1986   :  { %29 = sbr.rel (!%p27_p9) target bundleno = 15 (0xf), region = 151 }
0x198d   :  { %3055 = vsyncpa [#allocation3], 1 }
0x198e   :  { %3057 = vsyncpa [#allocation3 + $0x1], 1 }
0x198f   :  { %3058 = vsyncpa [#allocation6], 1 }
0x1990   :  { %3060 = vsyncpa [#allocation6 + $0x1], 1 }
0x1991   :  { %3061 = vsyncpa [#allocation9], 1 }
0x1992   :  { %3062 = vsyncpa [#allocation12], 1 }
0x1993   :  { %3063 = vsyncpa [#allocation4], 1 }
0x1994   :  { %3065 = vsyncpa [#allocation4 + $0x1], 1 }

</bundles_post_ra>
